<compile_context>
chip_gen: v6e
topology: v6e:2x2x1
jax: 0.10.0
libtpu: 0.0.40
codegen_flags: <defaults>
</compile_context>

<pallas_src>
import functools

import jax
import jax.numpy as jnp
from jax.experimental import pallas as pl
from jax.experimental.pallas import tpu as pltpu


# ---------------------------------------------------------------------------
# hardware-aware defaults
# ---------------------------------------------------------------------------

@functools.lru_cache(maxsize=None)
def _hw_config():
    """Tile / VMEM-limit defaults gated on the part's physical VMEM.

    v5e / v6e: 128 MiB VMEM per TensorCore -> big tiles + 96 MiB limit.
    v7x: 64 MiB -> conservative 48 MiB limit and smaller tiles.
    """
    cap = 64 * 1024 * 1024
    try:
        cap = int(pltpu.get_tpu_info().vmem_capacity_bytes)
    except Exception:
        pass
    if cap >= 128 * 1024 * 1024:
        return dict(vmem_limit=96 * 1024 * 1024, tm=512, th=1024, tq=512)
    return dict(vmem_limit=48 * 1024 * 1024, tm=256, th=512, tq=256)


# ---------------------------------------------------------------------------
# tile pickers
# ---------------------------------------------------------------------------

def _pick_row_tile(m, preferred):
    """Row (token) tile: <= preferred, rounded up to a multiple of 16."""
    t = min(preferred, m)
    return ((t + 15) // 16) * 16


def _pick_hidden_tile(hidden, preferred):
    """Hidden tile: full hidden if small, else a 128-multiple <= preferred."""
    t = min(preferred, hidden)
    if t >= 128:
        t = (t // 128) * 128
    return max(t, 1)


def _pick_seq_tile(n, preferred):
    """Query tile: full N if small, else the largest divisor of N that is a
    multiple of 8 and <= preferred; falls back to a single tile (N)."""
    if n <= preferred:
        return n
    for t in range(min(preferred, n), 7, -1):
        if t % 8 == 0 and n % t == 0:
            return t
    return n


def _layernorm_f32(x, g, b, eps):
    mu = jnp.mean(x, axis=-1, keepdims=True)
    var = jnp.mean(jnp.square(x - mu), axis=-1, keepdims=True)
    return (x - mu) * jax.lax.rsqrt(var + eps) * g + b


# ---------------------------------------------------------------------------
# PreNorm + Attention kernel  (grid = (batch, query tiles))
# ---------------------------------------------------------------------------

def _prenorm_attn_kernel(xf_ref, xt_ref, g_ref, beta_ref, wqkv_ref, wout_ref,
                         bout_ref, y_ref, *rest, heads, dim_head, scale, eps,
                         emit_amap):
    if emit_amap:
        amap_ref, k_sc, v_sc = rest
    else:
        k_sc, v_sc = rest

    inner = heads * dim_head
    dh = dim_head
    g = g_ref[...].astype(jnp.float32)
    beta = beta_ref[...].astype(jnp.float32)

    # --- once per batch element: LN over the full sequence, project K/V into
    #     head-major VMEM scratch (reused across all query tiles of this b).
    @pl.when(pl.program_id(1) == 0)
    def _project_kv():
        xf = xf_ref[0].astype(jnp.float32)                       # (N, dim)
        ln = _layernorm_f32(xf, g, beta, eps)
        # Single wide matmul for the K|V columns of W_qkv (bias-free Linear).
        kv = jnp.dot(ln.astype(wqkv_ref.dtype), wqkv_ref[:, inner:],
                     preferred_element_type=jnp.float32)         # (N, 2*inner)
        for h in range(heads):                                   # static split
            k_sc[h] = kv[:, h * dh:(h + 1) * dh].astype(k_sc.dtype)
            v_sc[h] = kv[:, inner + h * dh: inner + (h + 1) * dh].astype(v_sc.dtype)

    # --- per query tile ---
    xt = xt_ref[0].astype(jnp.float32)                           # (tq, dim)
    ln_t = _layernorm_f32(xt, g, beta, eps)
    q2 = jnp.dot(ln_t.astype(wqkv_ref.dtype), wqkv_ref[:, :inner],
                 preferred_element_type=jnp.float32)             # (tq, inner)
    q = jnp.stack([q2[:, h * dh:(h + 1) * dh] for h in range(heads)],
                  axis=0).astype(k_sc.dtype)                     # (heads, tq, dh)

    # Batched (over heads) q @ k^T on the MXU.
    dots = jnp.einsum('hqd,hkd->hqk', q, k_sc[...],
                      preferred_element_type=jnp.float32) * scale  # (heads, tq, N)

    # Manual softmax: exp + row-sum, divide via approx reciprocal on the EUP.
    m = jnp.max(dots, axis=-1, keepdims=True)
    p = jnp.exp(dots - m)
    attn = p * pl.reciprocal(jnp.sum(p, axis=-1, keepdims=True), approx=True)

    if emit_amap:                                                # final layer only
        amap_ref[0] = attn.astype(amap_ref.dtype)

    o = jnp.einsum('hqk,hkd->hqd', attn.astype(v_sc.dtype), v_sc[...],
                   preferred_element_type=jnp.float32)           # (heads, tq, dh)
    o_cat = jnp.concatenate([o[h] for h in range(heads)], axis=-1)  # (tq, inner)

    # Residual + output-projection bias folded in; single K=inner matmul.
    y = xt + bout_ref[...].astype(jnp.float32)
    y = y + jnp.dot(o_cat.astype(wout_ref.dtype), wout_ref[...],
                    preferred_element_type=jnp.float32)
    y_ref[0] = y.astype(y_ref.dtype)


def prenorm_attention(x, gamma, beta, w_qkv, w_out, b_out, *, heads, dim_head,
                      eps=1e-5, emit_amap=False, tq=None):
    B, N, dim = x.shape
    inner = heads * dim_head
    scale = float(dim_head) ** -0.5
    cfg = _hw_config()
    tq_eff = _pick_seq_tile(N, tq if tq is not None else cfg["tq"])
    n_q = N // tq_eff
    cdt = w_qkv.dtype
    itemsize = x.dtype.itemsize

    cost = pl.CostEstimate(
        flops=int(2 * B * N * dim * 3 * inner            # qkv projection
                  + 4 * B * heads * N * N * dim_head     # q@k^T and attn@v
                  + 2 * B * N * inner * dim),            # output projection
        transcendentals=int(B * heads * N * N),          # softmax exp
        bytes_accessed=int(2 * B * N * dim * itemsize
                           + (dim * 3 * inner + inner * dim + dim) * cdt.itemsize
                           + (B * heads * N * N * 4 if emit_amap else 0)),
    )

    kernel = functools.partial(_prenorm_attn_kernel, heads=heads,
                               dim_head=dim_head, scale=scale, eps=eps,
                               emit_amap=emit_amap)

    out_shape = [jax.ShapeDtypeStruct((B, N, dim), x.dtype)]
    out_specs = [pl.BlockSpec((1, tq_eff, dim), lambda b, qi: (b, qi, 0))]
    if emit_amap:
        out_shape.append(jax.ShapeDtypeStruct((B, heads, N, N), jnp.float32))
        out_specs.append(
            pl.BlockSpec((1, heads, tq_eff, N), lambda b, qi: (b, 0, qi, 0)))

    result = pl.pallas_call(
        kernel,
        out_shape=tuple(out_shape),
        grid_spec=pltpu.PrefetchScalarGridSpec(
            num_scalar_prefetch=0,
            grid=(B, n_q),
            in_specs=[
                pl.BlockSpec((1, N, dim), lambda b, qi: (b, 0, 0)),    # x (full seq, for K/V)
                pl.BlockSpec((1, tq_eff, dim), lambda b, qi: (b, qi, 0)),  # x (query tile)
                pl.BlockSpec((1, dim), lambda b, qi: (0, 0)),          # LN gamma
                pl.BlockSpec((1, dim), lambda b, qi: (0, 0)),          # LN beta
                pl.BlockSpec((dim, 3 * inner), lambda b, qi: (0, 0)),  # W_qkv
                pl.BlockSpec((inner, dim), lambda b, qi: (0, 0)),      # W_out
                pl.BlockSpec((1, dim), lambda b, qi: (0, 0)),          # b_out
            ],
            out_specs=tuple(out_specs),
            # Head-major K/V cache; written at qi==0, reused across query tiles,
            # hence the query axis must stay "arbitrary" (sequential per core).
            scratch_shapes=[pltpu.VMEM((heads, N, dim_head), cdt),
                            pltpu.VMEM((heads, N, dim_head), cdt)],
        ),
        compiler_params=pltpu.CompilerParams(
            dimension_semantics=("parallel", "arbitrary"),
            vmem_limit_bytes=cfg["vmem_limit"]),
        cost_estimate=cost,
    )(x, x, gamma, beta, w_qkv, w_out, b_out)

    if emit_amap:
        y, amap = result
        return y, amap
    (y,) = result
    return y, None


# ---------------------------------------------------------------------------
# PreNorm + FeedForward kernel  (grid = (row tiles, hidden tiles))
# ---------------------------------------------------------------------------

def _prenorm_ffn_kernel(x_ref, g_ref, beta_ref, w1_ref, b1_ref, w2_ref, b2_ref,
                        o_ref, ln_sc, acc_sc, *, eps, approx_gelu):
    k = pl.program_id(1)

    @pl.when(k == 0)
    def _init():
        x = x_ref[...].astype(jnp.float32)
        # Padded rows are all-zero: var=0, rsqrt(eps) finite; results discarded.
        ln = _layernorm_f32(x, g_ref[...].astype(jnp.float32),
                            beta_ref[...].astype(jnp.float32), eps)
        ln_sc[...] = ln.astype(ln_sc.dtype)              # compute-dtype scratch, cast once
        # Fold residual (+x) and second Linear's bias (+b2) into the accumulator.
        acc_sc[...] = x + b2_ref[...].astype(jnp.float32)

    # Partial hidden slab; exact-erf GELU by default (PyTorch nn.GELU).
    h = jnp.dot(ln_sc[...], w1_ref[...],
                preferred_element_type=jnp.float32) + b1_ref[...].astype(jnp.float32)
    h = jax.nn.gelu(h, approximate=approx_gelu)
    acc_sc[...] += jnp.dot(h.astype(w2_ref.dtype), w2_ref[...],
                           preferred_element_type=jnp.float32)

    @pl.when(k == pl.num_programs(1) - 1)
    def _finish():
        o_ref[...] = acc_sc[...].astype(o_ref.dtype)


def prenorm_feed_forward(x, gamma, beta, w1, b1, w2, b2, *, eps=1e-5,
                         tm=None, th=None, approx_gelu=False):
    B, N, dim = x.shape
    hidden = w1.shape[1]
    cfg = _hw_config()
    tm = tm if tm is not None else cfg["tm"]
    th = th if th is not None else cfg["th"]

    M = B * N
    tm_eff = _pick_row_tile(M, tm)
    th_eff = _pick_hidden_tile(hidden, th)
    Mp = pl.cdiv(M, tm_eff) * tm_eff
    Hp = pl.cdiv(hidden, th_eff) * th_eff

    x2 = x.reshape(M, dim)
    if Mp != M:
        x2 = jnp.pad(x2, ((0, Mp - M), (0, 0)))
    if Hp != hidden:
        # Zero-padded hidden units: GELU(0)=0 and zero W2 rows contribute nothing.
        w1 = jnp.pad(w1, ((0, 0), (0, Hp - hidden)))
        b1 = jnp.pad(b1, ((0, 0), (0, Hp - hidden)))
        w2 = jnp.pad(w2, ((0, Hp - hidden), (0, 0)))

    cost = pl.CostEstimate(
        flops=int(4 * Mp * dim * Hp),
        transcendentals=int(Mp * Hp),
        bytes_accessed=int(2 * Mp * dim * x.dtype.itemsize
                           + (dim * Hp + Hp * dim) * w1.dtype.itemsize
                           + (Hp + 2 * dim) * 4),
    )

    out = pl.pallas_call(
        functools.partial(_prenorm_ffn_kernel, eps=eps, approx_gelu=approx_gelu),
        out_shape=jax.ShapeDtypeStruct((Mp, dim), x.dtype),
        grid_spec=pltpu.PrefetchScalarGridSpec(
            num_scalar_prefetch=0,
            grid=(Mp // tm_eff, Hp // th_eff),           # reduction (hidden) axis last
            in_specs=[
                pl.BlockSpec((tm_eff, dim), lambda i, k: (i, 0)),    # x tile
                pl.BlockSpec((1, dim), lambda i, k: (0, 0)),         # LN gamma
                pl.BlockSpec((1, dim), lambda i, k: (0, 0)),         # LN beta
                pl.BlockSpec((dim, th_eff), lambda i, k: (0, k)),    # W1 hidden-tile
                pl.BlockSpec((1, th_eff), lambda i, k: (0, k)),      # b1 hidden-tile
                pl.BlockSpec((th_eff, dim), lambda i, k: (k, 0)),    # W2 hidden-tile
                pl.BlockSpec((1, dim), lambda i, k: (0, 0)),         # b2
            ],
            out_specs=pl.BlockSpec((tm_eff, dim), lambda i, k: (i, 0)),
            scratch_shapes=[pltpu.VMEM((tm_eff, dim), w1.dtype),      # LN(x), compute dtype
                            pltpu.VMEM((tm_eff, dim), jnp.float32)],  # f32 accumulator
        ),
        compiler_params=pltpu.CompilerParams(
            dimension_semantics=("parallel", "arbitrary"),
            vmem_limit_bytes=cfg["vmem_limit"]),
        cost_estimate=cost,
    )(x2, gamma, beta, w1, b1, w2, b2)

    return out[:M].reshape(B, N, dim)


# ---------------------------------------------------------------------------
# parameter preparation + Transformer forward
# ---------------------------------------------------------------------------

def prepare_transformer_params(params, compute_dtype=None):
    """Cast matmul weights to the compute dtype ONCE (not per forward call)."""
    if compute_dtype is None:
        return params
    out = []
    for layer in params:
        a, f = dict(layer["attn"]), dict(layer["ffn"])
        a["w_qkv"] = a["w_qkv"].astype(compute_dtype)
        a["w_out"] = a["w_out"].astype(compute_dtype)
        f["w1"] = f["w1"].astype(compute_dtype)
        f["w2"] = f["w2"].astype(compute_dtype)
        out.append(dict(attn=a, ffn=f))
    return out


def transformer_forward(x, params, *, heads, dim_head, eps=1e-5,
                        tq=None, tm=None, th=None):
    depth = len(params)
    attn_map = None
    for li, layer in enumerate(params):
        last = li == depth - 1
        a = layer["attn"]
        x, amap = prenorm_attention(x, a["gamma"], a["beta"], a["w_qkv"],
                                    a["w_out"], a["b_out"], heads=heads,
                                    dim_head=dim_head, eps=eps,
                                    emit_amap=last, tq=tq)
        if last:
            attn_map = amap
        f = layer["ffn"]
        x = prenorm_feed_forward(x, f["gamma"], f["beta"], f["w1"], f["b1"],
                                 f["w2"], f["b2"], eps=eps, tm=tm, th=th)
    return x, attn_map


# ---------------------------------------------------------------------------
# pure-JAX reference
# ---------------------------------------------------------------------------

def transformer_reference(x, params, *, heads, dim_head, eps=1e-5):
    hp = jax.lax.Precision.HIGHEST
    attn_map = None
    B, N, _ = x.shape
    for layer in params:
        a = layer["attn"]
        ln = _layernorm_f32(x, a["gamma"], a["beta"], eps)
        qkv = jnp.einsum("bnd,de->bne", ln, a["w_qkv"], precision=hp)
        q, k, v = jnp.split(qkv, 3, axis=-1)
        split = lambda t: t.reshape(B, N, heads, dim_head).transpose(0, 2, 1, 3)
        q, k, v = split(q), split(k), split(v)
        dots = jnp.einsum("bhnd,bhmd->bhnm", q, k, precision=hp) * (dim_head ** -0.5)
        attn_map = jax.nn.softmax(dots, axis=-1)
        o = jnp.einsum("bhnm,bhmd->bhnd", attn_map, v, precision=hp)
        o = o.transpose(0, 2, 1, 3).reshape(B, N, heads * dim_head)
        x = jnp.einsum("bnd,de->bne", o, a["w_out"], precision=hp) + a["b_out"] + x

        f = layer["ffn"]
        ln = _layernorm_f32(x, f["gamma"], f["beta"], eps)
        h = jax.nn.gelu(jnp.einsum("bnd,dh->bnh", ln, f["w1"], precision=hp) + f["b1"],
                        approximate=False)
        x = jnp.einsum("bnh,hd->bnd", h, f["w2"], precision=hp) + f["b2"] + x
    return x, attn_map


# ---------------------------------------------------------------------------
# test
# ---------------------------------------------------------------------------

if __name__ == "__main__":
    # Small, lane-dense config (dim multiple of 128); tiles picked so that both
    # grids are actually exercised: attention (B, 2 query tiles), FFN (2, 2).
    B, N = 2, 16
    dim, depth, heads, dim_head, mlp_dim = 128, 2, 4, 32, 256
    inner = heads * dim_head

    key = jax.random.PRNGKey(0)
    kx, key = jax.random.split(key)
    x = jax.random.normal(kx, (B, N, dim), dtype=jnp.float32)

    params = []
    for _ in range(depth):
        keys = jax.random.split(key, 12)
        key = keys[0]
        lim_qkv = 1.0 / jnp.sqrt(dim)
        lim_out = 1.0 / jnp.sqrt(inner)
        lim1 = 1.0 / jnp.sqrt(dim)
        lim2 = 1.0 / jnp.sqrt(mlp_dim)
        params.append(dict(
            attn=dict(
                gamma=1.0 + 0.1 * jax.random.normal(keys[1], (1, dim), jnp.float32),
                beta=0.1 * jax.random.normal(keys[2], (1, dim), jnp.float32),
                w_qkv=jax.random.uniform(keys[3], (dim, 3 * inner), jnp.float32,
                                         -lim_qkv, lim_qkv),
                w_out=jax.random.uniform(keys[4], (inner, dim), jnp.float32,
                                         -lim_out, lim_out),
                b_out=jax.random.uniform(keys[5], (1, dim), jnp.float32,
                                         -lim_out, lim_out),
            ),
            ffn=dict(
                gamma=1.0 + 0.1 * jax.random.normal(keys[6], (1, dim), jnp.float32),
                beta=0.1 * jax.random.normal(keys[7], (1, dim), jnp.float32),
                w1=jax.random.uniform(keys[8], (dim, mlp_dim), jnp.float32, -lim1, lim1),
                b1=jax.random.uniform(keys[9], (1, mlp_dim), jnp.float32, -lim1, lim1),
                w2=jax.random.uniform(keys[10], (mlp_dim, dim), jnp.float32, -lim2, lim2),
                b2=jax.random.uniform(keys[11], (1, dim), jnp.float32, -lim2, lim2),
            ),
        ))

    # Weights stay f32 here (compute_dtype=None); on v5e/v6e/v7x pass
    # compute_dtype=jnp.bfloat16 for halved weight traffic + faster MXU.
    prepared = prepare_transformer_params(params, compute_dtype=None)

    out, attn_map = transformer_forward(x, prepared, heads=heads, dim_head=dim_head,
                                        tq=8, tm=16, th=128)
    out = jax.block_until_ready(out)
    attn_map = jax.block_until_ready(attn_map)

    ref_out, ref_map = transformer_reference(x, params, heads=heads, dim_head=dim_head)

    assert out.shape == (B, N, dim)
    assert attn_map.shape == (B, heads, N, N)
    assert jnp.allclose(out, ref_out, atol=1e-2, rtol=1e-2), \
        float(jnp.max(jnp.abs(out - ref_out)))
    assert jnp.allclose(attn_map, ref_map, atol=1e-2, rtol=1e-2), \
        float(jnp.max(jnp.abs(attn_map - ref_map)))

    print("KERNEL_OK")
</pallas_src>

<mosaic_0001>
module attributes {stable_mosaic.version = 11 : i64} {
  func.func @_prenorm_attn_kernel(%arg0: i32, %arg1: i32, %arg2: memref<1x16x128xf32, #tpu.memory_space<vmem>>, %arg3: memref<1x8x128xf32, #tpu.memory_space<vmem>>, %arg4: memref<1x128xf32, #tpu.memory_space<vmem>>, %arg5: memref<1x128xf32, #tpu.memory_space<vmem>>, %arg6: memref<128x384xf32, #tpu.memory_space<vmem>>, %arg7: memref<128x128xf32, #tpu.memory_space<vmem>>, %arg8: memref<1x128xf32, #tpu.memory_space<vmem>>, %arg9: memref<1x8x128xf32, #tpu.memory_space<vmem>>, %arg10: memref<4x16x32xf32, #tpu.memory_space<vmem>>, %arg11: memref<4x16x32xf32, #tpu.memory_space<vmem>>) attributes {dimension_semantics = [#tpu.dimension_semantics<parallel>, #tpu.dimension_semantics<arbitrary>], iteration_bounds = array<i64: 2, 2>, scalar_prefetch = 0 : i64, scratch_operands = 2 : i64, tpu.core_type = #tpu.core_type<tc>, window_params = [{transform_indices = @transform_0, window_bounds = array<i64: 1, 16, 128>}, {transform_indices = @transform_1, window_bounds = array<i64: 1, 8, 128>}, {pipeline_mode = #tpu.pipeline_mode<synchronous>, transform_indices = @transform_2, window_bounds = array<i64: 1, 128>}, {pipeline_mode = #tpu.pipeline_mode<synchronous>, transform_indices = @transform_3, window_bounds = array<i64: 1, 128>}, {pipeline_mode = #tpu.pipeline_mode<synchronous>, transform_indices = @transform_4, window_bounds = array<i64: 128, 384>}, {pipeline_mode = #tpu.pipeline_mode<synchronous>, transform_indices = @transform_5, window_bounds = array<i64: 128, 128>}, {pipeline_mode = #tpu.pipeline_mode<synchronous>, transform_indices = @transform_6, window_bounds = array<i64: 1, 128>}, {transform_indices = @transform_7, window_bounds = array<i64: 1, 8, 128>}]} {
    %c0 = arith.constant 0 : index
    %c0_0 = arith.constant 0 : index
    %0 = vector.load %arg4[%c0, %c0_0] : memref<1x128xf32, #tpu.memory_space<vmem>>, vector<1x128xf32>
    %c0_1 = arith.constant 0 : index
    %c0_2 = arith.constant 0 : index
    %1 = vector.load %arg5[%c0_1, %c0_2] : memref<1x128xf32, #tpu.memory_space<vmem>>, vector<1x128xf32>
    %c0_i32 = arith.constant 0 : i32
    %2 = arith.cmpi eq, %arg1, %c0_i32 : i32
    %3 = arith.extui %2 : i1 to i32
    %c0_i32_3 = arith.constant 0 : i32
    %4 = arith.cmpi ne, %3, %c0_i32_3 : i32
    scf.if %4 {
      %c0_33 = arith.constant 0 : index
      %c0_34 = arith.constant 0 : index
      %c0_35 = arith.constant 0 : index
      %74 = vector.load %arg2[%c0_33, %c0_34, %c0_35] : memref<1x16x128xf32, #tpu.memory_space<vmem>>, vector<1x16x128xf32>
      %75 = vector.shape_cast %74 : vector<1x16x128xf32> to vector<16x128xf32>
      %cst_36 = arith.constant dense<0.000000e+00> : vector<16xf32>
      %76 = vector.multi_reduction <add>, %75, %cst_36 [1] : vector<16x128xf32> to vector<16xf32>
      %77 = vector.shape_cast %76 : vector<16xf32> to vector<16x1xf32>
      %cst_37 = arith.constant 1.280000e+02 : f32
      %78 = vector.broadcast %cst_37 : f32 to vector<16x1xf32>
      %79 = arith.divf %77, %78 : vector<16x1xf32>
      %80 = vector.broadcast %79 : vector<16x1xf32> to vector<16x128xf32>
      %81 = arith.subf %75, %80 : vector<16x128xf32>
      %82 = arith.mulf %81, %81 : vector<16x128xf32>
      %cst_38 = arith.constant dense<0.000000e+00> : vector<16xf32>
      %83 = vector.multi_reduction <add>, %82, %cst_38 [1] : vector<16x128xf32> to vector<16xf32>
      %84 = vector.shape_cast %83 : vector<16xf32> to vector<16x1xf32>
      %cst_39 = arith.constant 1.280000e+02 : f32
      %85 = vector.broadcast %cst_39 : f32 to vector<16x1xf32>
      %86 = arith.divf %84, %85 : vector<16x1xf32>
      %87 = vector.broadcast %79 : vector<16x1xf32> to vector<16x128xf32>
      %88 = arith.subf %75, %87 : vector<16x128xf32>
      %cst_40 = arith.constant 9.99999974E-6 : f32
      %89 = vector.broadcast %cst_40 : f32 to vector<16x1xf32>
      %90 = arith.addf %86, %89 : vector<16x1xf32>
      %91 = math.rsqrt %90 : vector<16x1xf32>
      %92 = vector.broadcast %91 : vector<16x1xf32> to vector<16x128xf32>
      %93 = arith.mulf %88, %92 : vector<16x128xf32>
      %94 = vector.broadcast %0 : vector<1x128xf32> to vector<16x128xf32>
      %95 = arith.mulf %93, %94 : vector<16x128xf32>
      %96 = vector.broadcast %1 : vector<1x128xf32> to vector<16x128xf32>
      %97 = arith.addf %95, %96 : vector<16x128xf32>
      %c0_41 = arith.constant 0 : index
      %c128 = arith.constant 128 : index
      %98 = vector.load %arg6[%c0_41, %c128] : memref<128x384xf32, #tpu.memory_space<vmem>>, vector<128x256xf32>
      %cst_42 = arith.constant dense<0.000000e+00> : vector<16x256xf32>
      %99 = tpu.matmul %97, %98, %cst_42 {dimension_numbers = #tpu.dot_dimension_numbers<[1], [0], [0], [1], [0, 0, 1, 1], [], []>} : vector<16x128xf32>, vector<128x256xf32>, vector<16x256xf32> -> vector<16x256xf32>
      %100 = vector.extract_strided_slice %99 {offsets = [0, 0], sizes = [16, 32], strides = [1, 1]} : vector<16x256xf32> to vector<16x32xf32>
      %c0_43 = arith.constant 0 : index
      %c0_44 = arith.constant 0 : index
      %c0_45 = arith.constant 0 : index
      %101 = vector.load %arg10[%c0_43, %c0_44, %c0_45] : memref<4x16x32xf32, #tpu.memory_space<vmem>>, vector<1x16x32xf32>
      %102 = vector.shape_cast %101 : vector<1x16x32xf32> to vector<16x32xf32>
      %103 = vector.shape_cast %100 : vector<16x32xf32> to vector<1x16x32xf32>
      tpu.vector_store %arg10[%c0_43, %c0_44, %c0_45], %103 {strides = array<i32>} : memref<4x16x32xf32, #tpu.memory_space<vmem>>, vector<1x16x32xf32>,
      %104 = vector.extract_strided_slice %99 {offsets = [0, 128], sizes = [16, 32], strides = [1, 1]} : vector<16x256xf32> to vector<16x32xf32>
      %c0_46 = arith.constant 0 : index
      %c0_47 = arith.constant 0 : index
      %c0_48 = arith.constant 0 : index
      %105 = vector.load %arg11[%c0_46, %c0_47, %c0_48] : memref<4x16x32xf32, #tpu.memory_space<vmem>>, vector<1x16x32xf32>
      %106 = vector.shape_cast %105 : vector<1x16x32xf32> to vector<16x32xf32>
      %107 = vector.shape_cast %104 : vector<16x32xf32> to vector<1x16x32xf32>
      tpu.vector_store %arg11[%c0_46, %c0_47, %c0_48], %107 {strides = array<i32>} : memref<4x16x32xf32, #tpu.memory_space<vmem>>, vector<1x16x32xf32>,
      %108 = vector.extract_strided_slice %99 {offsets = [0, 32], sizes = [16, 32], strides = [1, 1]} : vector<16x256xf32> to vector<16x32xf32>
      %c1 = arith.constant 1 : index
      %c0_49 = arith.constant 0 : index
      %c0_50 = arith.constant 0 : index
      %109 = vector.load %arg10[%c1, %c0_49, %c0_50] : memref<4x16x32xf32, #tpu.memory_space<vmem>>, vector<1x16x32xf32>
      %110 = vector.shape_cast %109 : vector<1x16x32xf32> to vector<16x32xf32>
      %111 = vector.shape_cast %108 : vector<16x32xf32> to vector<1x16x32xf32>
      tpu.vector_store %arg10[%c1, %c0_49, %c0_50], %111 {strides = array<i32>} : memref<4x16x32xf32, #tpu.memory_space<vmem>>, vector<1x16x32xf32>,
      %112 = vector.extract_strided_slice %99 {offsets = [0, 160], sizes = [16, 32], strides = [1, 1]} : vector<16x256xf32> to vector<16x32xf32>
      %c1_51 = arith.constant 1 : index
      %c0_52 = arith.constant 0 : index
      %c0_53 = arith.constant 0 : index
      %113 = vector.load %arg11[%c1_51, %c0_52, %c0_53] : memref<4x16x32xf32, #tpu.memory_space<vmem>>, vector<1x16x32xf32>
      %114 = vector.shape_cast %113 : vector<1x16x32xf32> to vector<16x32xf32>
      %115 = vector.shape_cast %112 : vector<16x32xf32> to vector<1x16x32xf32>
      tpu.vector_store %arg11[%c1_51, %c0_52, %c0_53], %115 {strides = array<i32>} : memref<4x16x32xf32, #tpu.memory_space<vmem>>, vector<1x16x32xf32>,
      %116 = vector.extract_strided_slice %99 {offsets = [0, 64], sizes = [16, 32], strides = [1, 1]} : vector<16x256xf32> to vector<16x32xf32>
      %c2 = arith.constant 2 : index
      %c0_54 = arith.constant 0 : index
      %c0_55 = arith.constant 0 : index
      %117 = vector.load %arg10[%c2, %c0_54, %c0_55] : memref<4x16x32xf32, #tpu.memory_space<vmem>>, vector<1x16x32xf32>
      %118 = vector.shape_cast %117 : vector<1x16x32xf32> to vector<16x32xf32>
      %119 = vector.shape_cast %116 : vector<16x32xf32> to vector<1x16x32xf32>
      tpu.vector_store %arg10[%c2, %c0_54, %c0_55], %119 {strides = array<i32>} : memref<4x16x32xf32, #tpu.memory_space<vmem>>, vector<1x16x32xf32>,
      %120 = vector.extract_strided_slice %99 {offsets = [0, 192], sizes = [16, 32], strides = [1, 1]} : vector<16x256xf32> to vector<16x32xf32>
      %c2_56 = arith.constant 2 : index
      %c0_57 = arith.constant 0 : index
      %c0_58 = arith.constant 0 : index
      %121 = vector.load %arg11[%c2_56, %c0_57, %c0_58] : memref<4x16x32xf32, #tpu.memory_space<vmem>>, vector<1x16x32xf32>
      %122 = vector.shape_cast %121 : vector<1x16x32xf32> to vector<16x32xf32>
      %123 = vector.shape_cast %120 : vector<16x32xf32> to vector<1x16x32xf32>
      tpu.vector_store %arg11[%c2_56, %c0_57, %c0_58], %123 {strides = array<i32>} : memref<4x16x32xf32, #tpu.memory_space<vmem>>, vector<1x16x32xf32>,
      %124 = vector.extract_strided_slice %99 {offsets = [0, 96], sizes = [16, 32], strides = [1, 1]} : vector<16x256xf32> to vector<16x32xf32>
      %c3 = arith.constant 3 : index
      %c0_59 = arith.constant 0 : index
      %c0_60 = arith.constant 0 : index
      %125 = vector.load %arg10[%c3, %c0_59, %c0_60] : memref<4x16x32xf32, #tpu.memory_space<vmem>>, vector<1x16x32xf32>
      %126 = vector.shape_cast %125 : vector<1x16x32xf32> to vector<16x32xf32>
      %127 = vector.shape_cast %124 : vector<16x32xf32> to vector<1x16x32xf32>
      tpu.vector_store %arg10[%c3, %c0_59, %c0_60], %127 {strides = array<i32>} : memref<4x16x32xf32, #tpu.memory_space<vmem>>, vector<1x16x32xf32>,
      %128 = vector.extract_strided_slice %99 {offsets = [0, 224], sizes = [16, 32], strides = [1, 1]} : vector<16x256xf32> to vector<16x32xf32>
      %c3_61 = arith.constant 3 : index
      %c0_62 = arith.constant 0 : index
      %c0_63 = arith.constant 0 : index
      %129 = vector.load %arg11[%c3_61, %c0_62, %c0_63] : memref<4x16x32xf32, #tpu.memory_space<vmem>>, vector<1x16x32xf32>
      %130 = vector.shape_cast %129 : vector<1x16x32xf32> to vector<16x32xf32>
      %131 = vector.shape_cast %128 : vector<16x32xf32> to vector<1x16x32xf32>
      tpu.vector_store %arg11[%c3_61, %c0_62, %c0_63], %131 {strides = array<i32>} : memref<4x16x32xf32, #tpu.memory_space<vmem>>, vector<1x16x32xf32>,
    } else {
    }
    %c0_4 = arith.constant 0 : index
    %c0_5 = arith.constant 0 : index
    %c0_6 = arith.constant 0 : index
    %5 = vector.load %arg3[%c0_4, %c0_5, %c0_6] : memref<1x8x128xf32, #tpu.memory_space<vmem>>, vector<1x8x128xf32>
    %6 = vector.shape_cast %5 : vector<1x8x128xf32> to vector<8x128xf32>
    %cst = arith.constant dense<0.000000e+00> : vector<8xf32>
    %7 = vector.multi_reduction <add>, %6, %cst [1] : vector<8x128xf32> to vector<8xf32>
    %8 = vector.shape_cast %7 : vector<8xf32> to vector<8x1xf32>
    %cst_7 = arith.constant 1.280000e+02 : f32
    %9 = vector.broadcast %cst_7 : f32 to vector<8x1xf32>
    %10 = arith.divf %8, %9 : vector<8x1xf32>
    %11 = vector.broadcast %10 : vector<8x1xf32> to vector<8x128xf32>
    %12 = arith.subf %6, %11 : vector<8x128xf32>
    %13 = arith.mulf %12, %12 : vector<8x128xf32>
    %cst_8 = arith.constant dense<0.000000e+00> : vector<8xf32>
    %14 = vector.multi_reduction <add>, %13, %cst_8 [1] : vector<8x128xf32> to vector<8xf32>
    %15 = vector.shape_cast %14 : vector<8xf32> to vector<8x1xf32>
    %cst_9 = arith.constant 1.280000e+02 : f32
    %16 = vector.broadcast %cst_9 : f32 to vector<8x1xf32>
    %17 = arith.divf %15, %16 : vector<8x1xf32>
    %18 = vector.broadcast %10 : vector<8x1xf32> to vector<8x128xf32>
    %19 = arith.subf %6, %18 : vector<8x128xf32>
    %cst_10 = arith.constant 9.99999974E-6 : f32
    %20 = vector.broadcast %cst_10 : f32 to vector<8x1xf32>
    %21 = arith.addf %17, %20 : vector<8x1xf32>
    %22 = math.rsqrt %21 : vector<8x1xf32>
    %23 = vector.broadcast %22 : vector<8x1xf32> to vector<8x128xf32>
    %24 = arith.mulf %19, %23 : vector<8x128xf32>
    %25 = vector.broadcast %0 : vector<1x128xf32> to vector<8x128xf32>
    %26 = arith.mulf %24, %25 : vector<8x128xf32>
    %27 = vector.broadcast %1 : vector<1x128xf32> to vector<8x128xf32>
    %28 = arith.addf %26, %27 : vector<8x128xf32>
    %c0_11 = arith.constant 0 : index
    %c0_12 = arith.constant 0 : index
    %29 = vector.load %arg6[%c0_11, %c0_12] : memref<128x384xf32, #tpu.memory_space<vmem>>, vector<128x128xf32>
    %cst_13 = arith.constant dense<0.000000e+00> : vector<8x128xf32>
    %30 = tpu.matmul %28, %29, %cst_13 {dimension_numbers = #tpu.dot_dimension_numbers<[1], [0], [0], [1], [0, 0, 1, 1], [], []>} : vector<8x128xf32>, vector<128x128xf32>, vector<8x128xf32> -> vector<8x128xf32>
    %31 = vector.extract_strided_slice %30 {offsets = [0, 0], sizes = [8, 32], strides = [1, 1]} : vector<8x128xf32> to vector<8x32xf32>
    %32 = vector.extract_strided_slice %30 {offsets = [0, 32], sizes = [8, 32], strides = [1, 1]} : vector<8x128xf32> to vector<8x32xf32>
    %33 = vector.extract_strided_slice %30 {offsets = [0, 64], sizes = [8, 32], strides = [1, 1]} : vector<8x128xf32> to vector<8x32xf32>
    %34 = vector.extract_strided_slice %30 {offsets = [0, 96], sizes = [8, 32], strides = [1, 1]} : vector<8x128xf32> to vector<8x32xf32>
    %35 = vector.shape_cast %31 : vector<8x32xf32> to vector<1x8x32xf32>
    %36 = vector.shape_cast %32 : vector<8x32xf32> to vector<1x8x32xf32>
    %37 = vector.shape_cast %33 : vector<8x32xf32> to vector<1x8x32xf32>
    %38 = vector.shape_cast %34 : vector<8x32xf32> to vector<1x8x32xf32>
    %39 = tpu.concatenate %35, %36, %37, %38 in 0 : vector<1x8x32xf32>, vector<1x8x32xf32>, vector<1x8x32xf32>, vector<1x8x32xf32> -> vector<4x8x32xf32>
    %c0_14 = arith.constant 0 : index
    %c0_15 = arith.constant 0 : index
    %c0_16 = arith.constant 0 : index
    %40 = vector.load %arg10[%c0_14, %c0_15, %c0_16] : memref<4x16x32xf32, #tpu.memory_space<vmem>>, vector<4x16x32xf32>
    "tpu.trace_start"() <{level = 10 : i32, message = "hqd,hkd->hqk"}> : () -> ()
    %cst_17 = arith.constant dense<0.000000e+00> : vector<4x8x16xf32>
    %41 = tpu.matmul %39, %40, %cst_17 {dimension_numbers = #tpu.dot_dimension_numbers<[2], [2], [1], [1], [0, 0, 0, 1, 1, 1], [0], [0]>} : vector<4x8x32xf32>, vector<4x16x32xf32>, vector<4x8x16xf32> -> vector<4x8x16xf32>
    "tpu.trace_stop"() : () -> ()
    %cst_18 = arith.constant 0.176776692 : f32
    %42 = vector.broadcast %cst_18 : f32 to vector<4x8x16xf32>
    %43 = arith.mulf %41, %42 : vector<4x8x16xf32>
    %cst_19 = arith.constant dense<0xFF800000> : vector<4x8xf32>
    %44 = vector.multi_reduction <maximumf>, %43, %cst_19 [2] : vector<4x8x16xf32> to vector<4x8xf32>
    %45 = vector.shape_cast %44 : vector<4x8xf32> to vector<4x8x1xf32>
    %46 = vector.broadcast %45 : vector<4x8x1xf32> to vector<4x8x16xf32>
    %47 = arith.subf %43, %46 : vector<4x8x16xf32>
    %48 = math.exp %47 : vector<4x8x16xf32>
    %cst_20 = arith.constant dense<0.000000e+00> : vector<4x8xf32>
    %49 = vector.multi_reduction <add>, %48, %cst_20 [2] : vector<4x8x16xf32> to vector<4x8xf32>
    %50 = vector.shape_cast %49 : vector<4x8xf32> to vector<4x8x1xf32>
    %51 = tpu.reciprocal %50 {approx = true} : vector<4x8x1xf32> -> vector<4x8x1xf32>
    %52 = vector.broadcast %51 : vector<4x8x1xf32> to vector<4x8x16xf32>
    %53 = arith.mulf %48, %52 : vector<4x8x16xf32>
    %c0_21 = arith.constant 0 : index
    %c0_22 = arith.constant 0 : index
    %c0_23 = arith.constant 0 : index
    %54 = vector.load %arg11[%c0_21, %c0_22, %c0_23] : memref<4x16x32xf32, #tpu.memory_space<vmem>>, vector<4x16x32xf32>
    "tpu.trace_start"() <{level = 10 : i32, message = "hqk,hkd->hqd"}> : () -> ()
    %cst_24 = arith.constant dense<0.000000e+00> : vector<4x8x32xf32>
    %55 = tpu.matmul %53, %54, %cst_24 {dimension_numbers = #tpu.dot_dimension_numbers<[2], [1], [1], [2], [0, 0, 0, 1, 1, 2], [0], [0]>} : vector<4x8x16xf32>, vector<4x16x32xf32>, vector<4x8x32xf32> -> vector<4x8x32xf32>
    "tpu.trace_stop"() : () -> ()
    %56 = vector.extract_strided_slice %55 {offsets = [0, 0, 0], sizes = [1, 8, 32], strides = [1, 1, 1]} : vector<4x8x32xf32> to vector<1x8x32xf32>
    %57 = vector.shape_cast %56 : vector<1x8x32xf32> to vector<8x32xf32>
    %58 = vector.extract_strided_slice %55 {offsets = [1, 0, 0], sizes = [1, 8, 32], strides = [1, 1, 1]} : vector<4x8x32xf32> to vector<1x8x32xf32>
    %59 = vector.shape_cast %58 : vector<1x8x32xf32> to vector<8x32xf32>
    %60 = vector.extract_strided_slice %55 {offsets = [2, 0, 0], sizes = [1, 8, 32], strides = [1, 1, 1]} : vector<4x8x32xf32> to vector<1x8x32xf32>
    %61 = vector.shape_cast %60 : vector<1x8x32xf32> to vector<8x32xf32>
    %62 = vector.extract_strided_slice %55 {offsets = [3, 0, 0], sizes = [1, 8, 32], strides = [1, 1, 1]} : vector<4x8x32xf32> to vector<1x8x32xf32>
    %63 = vector.shape_cast %62 : vector<1x8x32xf32> to vector<8x32xf32>
    %64 = tpu.concatenate %57, %59, %61, %63 in 1 : vector<8x32xf32>, vector<8x32xf32>, vector<8x32xf32>, vector<8x32xf32> -> vector<8x128xf32>
    %c0_25 = arith.constant 0 : index
    %c0_26 = arith.constant 0 : index
    %65 = vector.load %arg8[%c0_25, %c0_26] : memref<1x128xf32, #tpu.memory_space<vmem>>, vector<1x128xf32>
    %66 = vector.broadcast %65 : vector<1x128xf32> to vector<8x128xf32>
    %67 = arith.addf %6, %66 : vector<8x128xf32>
    %c0_27 = arith.constant 0 : index
    %c0_28 = arith.constant 0 : index
    %68 = vector.load %arg7[%c0_27, %c0_28] : memref<128x128xf32, #tpu.memory_space<vmem>>, vector<128x128xf32>
    %cst_29 = arith.constant dense<0.000000e+00> : vector<8x128xf32>
    %69 = tpu.matmul %64, %68, %cst_29 {dimension_numbers = #tpu.dot_dimension_numbers<[1], [0], [0], [1], [0, 0, 1, 1], [], []>} : vector<8x128xf32>, vector<128x128xf32>, vector<8x128xf32> -> vector<8x128xf32>
    %70 = arith.addf %67, %69 : vector<8x128xf32>
    %c0_30 = arith.constant 0 : index
    %c0_31 = arith.constant 0 : index
    %c0_32 = arith.constant 0 : index
    %71 = vector.load %arg9[%c0_30, %c0_31, %c0_32] : memref<1x8x128xf32, #tpu.memory_space<vmem>>, vector<1x8x128xf32>
    %72 = vector.shape_cast %71 : vector<1x8x128xf32> to vector<8x128xf32>
    %73 = vector.shape_cast %70 : vector<8x128xf32> to vector<1x8x128xf32>
    tpu.vector_store %arg9[%c0_30, %c0_31, %c0_32], %73 {strides = array<i32>} : memref<1x8x128xf32, #tpu.memory_space<vmem>>, vector<1x8x128xf32>,
    return
  }
  func.func @transform_0(%arg0: i32, %arg1: i32) -> (i32, i32, i32) {
    %c0_i32 = arith.constant 0 : i32
    %c0_i32_0 = arith.constant 0 : i32
    %c0_i32_1 = arith.constant 0 : i32
    return %arg0, %c0_i32, %c0_i32_0 : i32, i32, i32
  }
  func.func @transform_1(%arg0: i32, %arg1: i32) -> (i32, i32, i32) {
    %c0_i32 = arith.constant 0 : i32
    %c0_i32_0 = arith.constant 0 : i32
    return %arg0, %arg1, %c0_i32 : i32, i32, i32
  }
  func.func @transform_2(%arg0: i32, %arg1: i32) -> (i32, i32) {
    %c0_i32 = arith.constant 0 : i32
    %c0_i32_0 = arith.constant 0 : i32
    %c0_i32_1 = arith.constant 0 : i32
    return %c0_i32, %c0_i32_0 : i32, i32
  }
  func.func @transform_3(%arg0: i32, %arg1: i32) -> (i32, i32) {
    %c0_i32 = arith.constant 0 : i32
    %c0_i32_0 = arith.constant 0 : i32
    %c0_i32_1 = arith.constant 0 : i32
    return %c0_i32, %c0_i32_0 : i32, i32
  }
  func.func @transform_4(%arg0: i32, %arg1: i32) -> (i32, i32) {
    %c0_i32 = arith.constant 0 : i32
    %c0_i32_0 = arith.constant 0 : i32
    %c0_i32_1 = arith.constant 0 : i32
    return %c0_i32, %c0_i32_0 : i32, i32
  }
  func.func @transform_5(%arg0: i32, %arg1: i32) -> (i32, i32) {
    %c0_i32 = arith.constant 0 : i32
    %c0_i32_0 = arith.constant 0 : i32
    %c0_i32_1 = arith.constant 0 : i32
    return %c0_i32, %c0_i32_0 : i32, i32
  }
  func.func @transform_6(%arg0: i32, %arg1: i32) -> (i32, i32) {
    %c0_i32 = arith.constant 0 : i32
    %c0_i32_0 = arith.constant 0 : i32
    %c0_i32_1 = arith.constant 0 : i32
    return %c0_i32, %c0_i32_0 : i32, i32
  }
  func.func @transform_7(%arg0: i32, %arg1: i32) -> (i32, i32, i32) {
    %c0_i32 = arith.constant 0 : i32
    %c0_i32_0 = arith.constant 0 : i32
    return %arg0, %arg1, %c0_i32 : i32, i32, i32
  }
}

</mosaic_0001>

<bundles_post_ra>
// kernel: tpu_custom_call.1
= control target key start
LH: loop header
LB: loop body
LE: loop exit
PB: predicated region body
PF: predicated region fallthrough
CT: control target
= control target key end

     0   :  { %s2804_s0 = inlined_call_operand.hbm [shape: f32[2,16,128], index: 0, kind: input, shape index: {}]   ;;  %s2805_s1 = inlined_call_operand.hbm [shape: f32[2,16,128], index: 1, kind: input, shape index: {}]   ;;  %s2806_s2 = inlined_call_operand.vmem [shape: f32[1,128], index: 2, kind: input, shape index: {}]   ;;  %s2807_s3 = inlined_call_operand.vmem [shape: f32[1,128], index: 3, kind: input, shape index: {}]   ;;  %s2808_s4 = inlined_call_operand.hbm [shape: f32[128,384], index: 4, kind: input, shape index: {}]   ;;  %s2809_s5 = inlined_call_operand.hbm [shape: f32[128,128], index: 5, kind: input, shape index: {}]   ;;  %s2810_s6 = inlined_call_operand.vmem [shape: f32[1,128], index: 6, kind: input, shape index: {}]   ;;  %s2811_s7 = inlined_call_operand.hbm [shape: f32[2,16,128], index: 7, kind: output, shape index: {}]  }
   0x1   :  { %2821 = sst [smem:[#allocation25_spill]] %s2804_s0 }
   0x2   :  { %2822 = sst [smem:[#allocation26_spill]] %s2806_s2 }
   0x3   :  { %2823 = sst [smem:[#allocation27_spill]] %s2807_s3 }
   0x4   :  { %2824 = sst [smem:[#allocation28_spill]] %s2808_s4 }
   0x5   :  { %2825 = sst [smem:[#allocation29_spill]] %s2809_s5 }
   0x6   :  { %2826 = sst [smem:[#allocation30_spill]] %s2810_s6 }
   0x7   :  { %2827 = sst [smem:[#allocation31_spill]] %s2811_s7 }
   0x8   :  { %12 = vsyncpa [#allocation5], 0 }
   0x9   :  { %14 = vsyncpa [#allocation5 + $0x1], 0 }
   0xa   :  { %15 = vsyncpa [#allocation8], 0 }
   0xb   :  { %17 = vsyncpa [#allocation8 + $0x1], 0 }
   0xc   :  { %18 = vsyncpa [#allocation11], 0 }
   0xd   :  { %19 = vsyncpa [#allocation6], 0 }
   0xe   :  { %21 = vsyncpa [#allocation6 + $0x1], 0  ;;  %s2367_s24 = smov 0   ;;  %s2369_s25 = smov 0  }
   0xf   :  { %s2371_s26 = smov 0   ;;  %s2373_s27 = smov 0  }
  0x10   :  { %s2375_s28 = smov 0   ;;  %s2377_s29 = smov 0  }
  0x11   :  { %s2379_s30 = smov 0   ;;  %s2381_s8 = smov 0  }
  0x12   :  { %s2383_s9 = smov 0   ;;  %s2385_s10 = smov 0  }
  0x13   :  { %s2387_s11 = smov 0  }
  0x14 LB: > { %2828 = sst [smem:[#allocation18_spill]] %s2267_s24  ;;  %s2421_s12 = sadd.s32 4294967295, %s2307_s11   ;;  %s2307_s11 = sphi %s2387_s11, %s27_s11   ;;  %s2303_s10 = sphi %s2385_s10, %s2877_s10   ;;  %s2299_s9 = sphi %s2383_s9, %s2876_s9   ;;  %s2295_s8 = sphi %s2381_s8, %s2875_s8   ;;  %s2291_s30 = sphi %s2379_s30, %s2874_s30   ;;  %s2287_s29 = sphi %s2377_s29, %s2873_s29   ;;  %s2283_s28 = sphi %s2375_s28, %s2872_s28   ;;  %s2279_s27 = sphi %s2373_s27, %s2871_s27   ;;  %s2275_s26 = sphi %s2371_s26, %s2870_s26   ;;  %s2271_s25 = sphi %s2369_s25, %s2869_s25   ;;  %s2267_s24 = sphi %s2367_s24, %s2868_s24  }
  0x15   : > { %2829 = sst [smem:[#allocation19_spill]] %s2291_s30  ;;  %p59_p0 = scmp.ne.s32.totalorder %s2283_s28, %s2279_s27 }
  0x16   : > { %2830 = sst [smem:[#allocation20_spill]] %s2295_s8  ;;  %p2812_p1 = scmp.eq.s32.totalorder %s2421_s12, 0 }
  0x17   : > { %p1648_p3 = scmp.ge.s32.totalorder %s2307_s11, 1  ;;  %p231_p4 = scmp.lt.s32.totalorder %s2307_s11, 5 }
  0x18   : > { %p2430_p5 = por %p2812_p1, %p59_p0  ;;  %s2309_s15 = smov [#allocation9]  }
  0x19   : > { %p2434_p6 = pnand %p1648_p3, %p231_p4  ;;  %s249_s16 = sshll.u32 %s2309_s15, 4  ;;  %s250_s16 = int_to_ptr.vmem [resolvable:$true] %s249_s16 }
  0x1a   : > { %s2310_s18 = smov [#allocation10]   ;;  %s2078_s20 = scalar_lea.vmem %s250_s16, 6144 }
  0x1b   : > { %p1918_p7 = pneg %p2434_p6  ;;  %s262_s19 = sshll.u32 %s2310_s18, 4  ;;  %s263_s19 = int_to_ptr.vmem [resolvable:$true] %s262_s19 }
  0x1c   : > { %p2079_p10 = scmp.ne.s32.totalorder %s250_s16, %s2078_s20  ;;  %p2086_p13 = scmp.lt.s32.totalorder %s250_s16, %s250_s16 }
  0x1d   : > { %p2442_p8 = pnand %p1918_p7, %p2812_p1  ;;  %p2087_p0 = scmp.lt.s32.totalorder %s2078_s20, %s2078_s20 }
  0x1f   : > { %p2069_p9 = pneg %p2442_p8  ;;  %p2088_p3 = por %p2087_p0, %p2086_p13 }
  0x21   : > { %p2081_p11 = pnand %p2079_p10, %p2069_p9 }
  0x23   : > { %p2082_p12 = pneg %p2081_p11 }
  0x25   : > { %p2089_p4 = pnand %p2088_p3, %p2082_p12 }
  0x27   : > { %2092 = shalt.err (!%p2089_p4)
}
  0x28   : > { %s2311_s21 = smov 384   ;;  %s2312_s22 = smov 24  }
  0x29   : > { %s2834_s4 = sld [smem:[#allocation28_spill]]  ;;  %s2104_s15 = scalar_lea.vmem %s263_s19, 2048 }
  0x2a   : > { %p2105_p7 = scmp.ne.s32.totalorder %s263_s19, %s2104_s15  ;;  %p2112_p1 = scmp.lt.s32.totalorder %s263_s19, %s263_s19 }
  0x2b   : > { %p2113_p2 = scmp.lt.s32.totalorder %s2104_s15, %s2104_s15 }
  0x2c   : > { %p2107_p10 = pnand %p2105_p7, %p2069_p9 }
  0x2d   : > { %p2114_p13 = por %p2113_p2, %p2112_p1 }
  0x2e   : > { %p2108_p11 = pneg %p2107_p10 }
  0x2f   : > { %1921 = dma.hbm_to_vmem [thread:$0]  (!%p2442_p8), %s2834_s4, 6144, %s250_s16, [#allocation8], %s2311_s21, %s2311_s21, %s2312_s22  }
  0x30   : > { %p2115_p12 = pnand %p2114_p13, %p2108_p11 }
  0x32   : > { %2118 = shalt.err (!%p2115_p12)
}
  0x33   : > { %s2313_s18 = smov 128   ;;  %s2314_s16 = smov 8  }
  0x34   : > { %s2835_s5 = sld [smem:[#allocation29_spill]]  ;;  %p53_p1 = scmp.ne.s32.totalorder %s2287_s29, %s2283_s28 }
  0x35   : > { %p54_p2 = scmp.eq.s32.totalorder %s2307_s11, 0  ;;  %p1938_p9 = scmp.lt.s32.totalorder %s2307_s11, 4 }
  0x36   : > { %s279_s23 = sand.u32 1, %s2287_s29   ;;  %s1687_s15 = sshll.u32 %s2303_s10, 8 }
  0x37   : > { %p55_p0 = por %p54_p2, %p53_p1  ;;  %s1652_s27 = sshll.u32 %s279_s23, 4 }
  0x38   : > { %s2836_s0 = sld [smem:[#allocation25_spill]]  ;;  %s283_s6 = scalar_lea.vmem [#allocation4], %s1652_s27 }
  0x39   : > { %s290_s8 = sshll.u32 %s283_s6, 4  ;;  %p2481_p3 = pnand %p1938_p9, %p55_p0  ;;  %s291_s8 = int_to_ptr.vmem [resolvable:$true] %s290_s8 }
  0x3a   : > { %1924 = dma.hbm_to_vmem [thread:$0]  (!%p2442_p8), %s2835_s5, 2048, %s263_s19, [#allocation11], %s2313_s18, %s2313_s18, %s2314_s16  }
  0x3b   : > { %s280_s19 = scalar_lea.sflag [#allocation5], %s279_s23  ;;  %p2121_p8 = pneg %p2481_p3 }
  0x3c   : > { %s2132_s20 = scalar_lea.vmem %s291_s8, 256  ;;  %s2315_s21 = smov [#allocation4]  }
  0x3d   : > { %p2133_p4 = scmp.ne.s32.totalorder %s291_s8, %s2132_s20  ;;  %s2137_s22 = sshll.u32 %s2315_s21, 4  ;;  %s2138_s22 = int_to_ptr.vmem [resolvable:$false] %s2137_s22 }
  0x3e   : > { %s289_s17 = scalar_lea.hbm %s2836_s0, %s1687_s15  ;;  %s2139_s4 = scalar_lea.vmem %s2138_s22, 512 }
  0x3f   : > { %p2135_p7 = pnand %p2133_p4, %p2121_p8  ;;  %p2140_p11 = scmp.lt.s32.totalorder %s291_s8, %s2138_s22 }
  0x40   : > { %p2141_p13 = scmp.lt.s32.totalorder %s2139_s4, %s2132_s20 }
  0x41   : > { %p2136_p10 = pneg %p2135_p7 }
  0x42   : > { %p2142_p12 = por %p2141_p13, %p2140_p11 }
  0x44   : > { %p2143_p1 = pnand %p2142_p12, %p2136_p10 }
  0x46   : > { %2146 = shalt.err (!%p2143_p1)
}
  0x47   : > { %1928 = dma.hbm_to_vmem [thread:$0]  (!%p2481_p3), %s289_s17, 256, %s291_s8, %s280_s19, %s2313_s18, %s2313_s18, %s2314_s16  }
  0x48   : > { %s1647_s6 = sadd.s32 4294967294, %s2307_s11   ;;  %s36_s7 = sadd.s32 1, %s2299_s9 }
  0x49   : > { %p37_p0 = scmp.ge.s32.totalorder %s36_s7, 2  ;;  %s39_s30 = sadd.s32 1, %s2303_s10 }
  0x4a   : > { %s74_s22 = sadd.s32 1, %s2275_s26  ;;  %p81_p8 = scmp.ne.s32.totalorder %s2275_s26, %s2271_s25 }
  0x4b   : > { %s2879_s7 = smov (%p37_p0, %s36_s7), 0  ;;  %s2881_s30 = smov (!%p37_p0, %s39_s30), %s2303_s10 }
  0x4c   : > { %2838 = sst [smem:[#allocation21_spill]] %s2879_s7  ;;  %s70_s23 = ssub.s32 %s2299_s9, %s2879_s7 }
  0x4d   : > { %p2505_p3 = por %p81_p8, %p54_p2  ;;  %p41_p4 = scmp.ge.s32.totalorder %s2881_s30, 2 }
  0x4e   : > { %p87_p7 = scmp.ne.s32.totalorder %s2271_s25, %s2267_s24  ;;  %p2840_p10 = scmp.eq.s32.totalorder %s2421_s12, 3 }
  0x4f   : > { %p224_p13 = scmp.eq.s32.totalorder %s1647_s6, 3  ;;  %s2883_s30 = smov (%p41_p4, %s2881_s30), 0 }
  0x50   : > { %p2513_p11 = por %p2840_p10, %p81_p8  ;;  %2843 = sst [smem:[#allocation23_spill]] %s2883_s30 }
  0x51   : > { %p2844_p12 = scmp.eq.s32.totalorder %s2421_s12, 0  ;;  %p2525_p2 = por %p224_p13, %p87_p7 }
  0x52   : > { %s2841_s18 = scalar_select %p2513_p11, 1, 0 }
  0x53   : > { %p2521_p1 = por %p87_p7, %p2844_p12  ;;  %s43_s15 = ssub.s32 %s2303_s10, %s2883_s30 }
  0x54   : > { %2842 = sst [smem:[#allocation22_spill]] %s2841_s18  ;;  %s300_s17 = sand.u32 1, %s2307_s11  }
  0x55   : > { %s2846_s27 = scalar_select %p2525_p2, 1, 0 }
  0x56   : > { %p44_p0 = scmp.eq.s32.totalorder %s43_s15, 0  ;;  %s71_s19 = sor.u32 %s70_s23, %s43_s15 }
  0x57   : > { %2847 = sst [smem:[#allocation24_spill]] %s2846_s27  ;;  %p72_p8 = scmp.eq.s32.totalorder %s71_s19, 0 }
  0x58   : > { %s2848_s20 = sadd.s32 1, %s2287_s29  ;;  %s302_s6 = sand.u32 1, %s2275_s26  }
  0x59   : > { %s2535_s21 = scalar_select %p44_p0, %s2287_s29, %s2848_s20  }
  0x5a   : > { %s2538_s4 = scalar_select %p72_p8, %s2275_s26, %s74_s22  }
  0x5b   : > { %s1656_s0 = sshll.u32 %s2303_s10, 1  ;;  %s1655_s5 = sshll.u32 %s302_s6, 3 }
  0x5c   : > { %s309_s7 = sadd.s32 %s2299_s9, %s1656_s0  ;;  %s304_s27 = scalar_lea.vmem [#allocation7], %s1655_s5 }
  0x5d   : > { %s1657_s24 = sshll.u32 %s309_s7, 7  ;;  %s313_s2 = sshll.u32 %s304_s27, 4  ;;  %s314_s2 = int_to_ptr.vmem [resolvable:$true] %s313_s2 }
  0x5e   : > { %s311_s30 = scalar_lea.hbm %s2805_s1, %s1657_s24  ;;  %p2550_p4 = pnand %p1938_p9, %p2505_p3 }
  0x5f   : > { %s301_s22 = scalar_lea.sflag [#allocation8], %s300_s17  ;;  %s2160_s15 = scalar_lea.vmem %s314_s2, 128 }
  0x60   : > { %p2149_p7 = pneg %p2550_p4  ;;  %p2161_p10 = scmp.ne.s32.totalorder %s314_s2, %s2160_s15 }
  0x61   : > { %s2316_s0 = smov [#allocation7]  }
  0x62   : > { %p2163_p13 = pnand %p2161_p10, %p2149_p7  ;;  %s2165_s3 = sshll.u32 %s2316_s0, 4  ;;  %s2166_s3 = int_to_ptr.vmem [resolvable:$false] %s2165_s3 }
  0x63   : > { %s2167_s5 = scalar_lea.vmem %s2166_s3, 256  ;;  %p2168_p0 = scmp.lt.s32.totalorder %s314_s2, %s2166_s3 }
  0x64   : > { %p2164_p12 = pneg %p2163_p13  ;;  %p2169_p8 = scmp.lt.s32.totalorder %s2167_s5, %s2160_s15 }
  0x66   : > { %p2170_p2 = por %p2169_p8, %p2168_p0 }
  0x68   : > { %p2171_p11 = pnand %p2170_p2, %p2164_p12 }
  0x6a   : > { %2174 = shalt.err (!%p2171_p11)
}
  0x6b   : > { %1931 = dma.hbm_to_vmem [thread:$0]  (!%p2550_p4), %s311_s30, 128, %s314_s2, %s301_s22  }
  0x6c   : > { %322 = sbr.rel (%p2434_p6) target bundleno = 2439 (0x987), region = 48  ;;  %s324_s24 = sand.u32 (!%p2434_p6), 1, %s2283_s28  }
  0x6d   : > { %s1659_s7 = sshll.u32 (!%p2434_p6), %s324_s24, 4  ;;  %s325_s8 = scalar_lea.sflag (!%p2434_p6), [#allocation5], %s324_s24 }
  0x6e   : > { %s328_s18 = scalar_lea.vmem (!%p2434_p6), [#allocation4], %s1659_s7 }
  0x71   : > { %2246 = dma.done.wait (%p2430_p5), %s325_s8, 256  }
  0x72   : > { %2248 = vsyncadd (%p2430_p5), %s325_s8, 4294967040  ;;  %s333_s27 = sand.u32 1, %s2421_s12   ;;  %s335_s2 = sand.u32 1, %s2271_s25  }
  0x73   : > { %s2569_s14 = sshll.u32 %s335_s2, 3  ;;  %s334_s30 = scalar_lea.sflag [#allocation8], %s333_s27 }
  0x74   : > { %s337_s17 = scalar_lea.vmem [#allocation7], %s2569_s14 }
  0x75   : > { %2250 = dma.done.wait (%p2521_p1), %s334_s30, 128  }
  0x76   : > { %2252 = vsyncadd (%p2521_p1), %s334_s30, 4294967168  ;;  %p2850_p6 = scmp.eq.s32.totalorder %s2421_s12, 0 }
  0x78   : > { %2254 = dma.done.wait (%p2850_p6), [#allocation8], 6144   ;;  %p2851_p5 = pmov %p2850_p6 }
  0x7a   : > { %2256 = vsyncadd (%p2851_p5), [#allocation8], 4294961152  ;;  %p2852_p9 = pmov %p2851_p5 }
  0x7b   : > { %p2853_p3 = pmov %p2851_p5 }
  0x7c   : > { %2258 = dma.done.wait (%p2852_p9), [#allocation11], 2048  }
  0x7d   : > { %2260 = vsyncadd (%p2853_p3), [#allocation11], 4294965248  ;;  %s2854_s20 = sld [smem:[#allocation26_spill]]  ;;  %s380_s22 = scalar_lea.vmem [#allocation12], %s2569_s14 }
  0x7e   : > { %s2855_s23 = sld [smem:[#allocation27_spill]] }
  0x7f   : > { %s2856_s15 = sld [smem:[#allocation19_spill]] }
  0x83   : > { %v2587_v0 = vld [vmem:[%s2854_s20] sm:$0x1] }
  0x84   : > { %v2592_v1 = vld [vmem:[%s2855_s23] sm:$0x1] }
  0x85   : > { %p1664_p11 = scmp.ne.s32.totalorder %s2856_s15, 0 }
  0x86   : > { %s2318_s12 = smov (!%p1664_p11), 96   ;;  %s2319_s0 = smov (!%p1664_p11), 64  }
  0x87   : > { %386 = sbr.rel (%p1664_p11) target bundleno = 784 (0x310), region = 68  ;;  %s2320_s3 = smov (!%p1664_p11), 32  }
  0x8c   : > { %v387_v2 = vld [vmem:[%s328_s18] sm:$0xff]  ;;  %v388_v3 = vld [vmem:[%s328_s18 + $0x8] sm:$0xff]  ;;  %v2317_v44 = vmov 0.0   ;;  %v413_v50 = vlaneseq  ;;  %vm537_vm0 = vcmask 261120  }
  0x8d   : > { %389 = vadd.xlane.f32.xlu0 %v387_v2  ;;  %v459_v4 = vld [vmem:[#allocation9 + $0x178] sm:$0xff]  ;;  %v458_v5 = vld [vmem:[#allocation9 + $0x170] sm:$0xff]  ;;  %v457_v6 = vld [vmem:[#allocation9 + $0x160] sm:$0xff]  ;;  %524 = vmatprep.mubr.f32.mxu0 %v2317_v44 }
  0x8e   : > { %460 = vmatprep.subr.mxu0 %v459_v4  ;;  %v456_v7 = vld [vmem:[#allocation9 + $0x158] sm:$0xff]  ;;  %1872 = vmatprep.subr.mxu1 %v459_v4  ;;  %v455_v8 = vld [vmem:[#allocation9 + $0x148] sm:$0xff]  ;;  %v454_v9 = vld [vmem:[#allocation9 + $0x140] sm:$0xff]  ;;  %v414_v52 = vshrl.u32 %v413_v50, 7 }
  0x8f   : > { %461 = vmatpush1.msra.mxu0 %v458_v5  ;;  %1888 = vmatpush1.msra.mxu1 %v458_v5  ;;  %v453_v10 = vld [vmem:[#allocation9 + $0x130] sm:$0xff]  ;;  %v452_v11 = vld [vmem:[#allocation9 + $0x128] sm:$0xff]  ;;  %v451_v20 = vld [vmem:[#allocation9 + $0x118] sm:$0xff] }
  0x90   : > { %462 = vmatprep.subr.mxu0 %v457_v6  ;;  %1873 = vmatprep.subr.mxu1 %v457_v6  ;;  %v450_v21 = vld [vmem:[#allocation9 + $0x110] sm:$0xff]  ;;  %v449_v22 = vld [vmem:[#allocation9 + $0x100] sm:$0xff]  ;;  %v448_v23 = vld [vmem:[#allocation9 + $0xf8] sm:$0xff]  ;;  %v415_v53 = vsub.s32 0, %v414_v52 }
  0x91   : > { %391 = vadd.xlane.f32.xlu0 %v388_v3  ;;  %463 = vmatpush1.msra.mxu0 %v456_v7  ;;  %v447_v24 = vld [vmem:[#allocation9 + $0xe8] sm:$0xff]  ;;  %v446_v25 = vld [vmem:[#allocation9 + $0xe0] sm:$0xff]  ;;  %v445_v26 = vld [vmem:[#allocation9 + $0xd0] sm:$0xff] }
  0x92   : > { %1889 = vmatpush1.msra.mxu1 %v456_v7  ;;  %464 = vmatprep.subr.mxu0 %v455_v8  ;;  %v444_v27 = vld [vmem:[#allocation9 + $0xc8] sm:$0xff]  ;;  %v443_v28 = vld [vmem:[#allocation9 + $0xb8] sm:$0xff]  ;;  %v442_v29 = vld [vmem:[#allocation9 + $0xb0] sm:$0xff]  ;;  %v416_v54 = vrot.slane %v2587_v0, %v415_v53  ;;  %v424_v57 = vrot.slane %v2592_v1, %v415_v53 }
  0x93   : > { %1874 = vmatprep.subr.mxu1 %v455_v8  ;;  %465 = vmatpush1.msra.mxu0 %v454_v9  ;;  %v441_v30 = vld [vmem:[#allocation9 + $0xa0] sm:$0xff]  ;;  %v440_v31 = vld [vmem:[#allocation9 + $0x98] sm:$0xff]  ;;  %v439_v32 = vld [vmem:[#allocation9 + $0x88] sm:$0xff] }
  0x94   : > { %1890 = vmatpush1.msra.mxu1 %v454_v9  ;;  %466 = vmatprep.subr.mxu0 %v453_v10  ;;  %v438_v33 = vld [vmem:[#allocation9 + $0x80] sm:$0xff]  ;;  %v437_v34 = vld [vmem:[#allocation9 + $0x70] sm:$0xff]  ;;  %v436_v35 = vld [vmem:[#allocation9 + $0x68] sm:$0xff] }
  0x95   : > { %1875 = vmatprep.subr.mxu1 %v453_v10  ;;  %467 = vmatpush1.msra.mxu0 %v452_v11  ;;  %v435_v36 = vld [vmem:[#allocation9 + $0x58] sm:$0xff]  ;;  %v434_v37 = vld [vmem:[#allocation9 + $0x50] sm:$0xff]  ;;  %v433_v38 = vld [vmem:[#allocation9 + $0x40] sm:$0xff] }
  0x96   : > { %1891 = vmatpush1.msra.mxu1 %v452_v11  ;;  %468 = vmatprep.subr.mxu0 %v451_v20  ;;  %v432_v39 = vld [vmem:[#allocation9 + $0x38] sm:$0xff]  ;;  %v431_v40 = vld [vmem:[#allocation9 + $0x28] sm:$0xff]  ;;  %v430_v41 = vld [vmem:[#allocation9 + $0x20] sm:$0xff] }
  0x97   : > { %1876 = vmatprep.subr.mxu1 %v451_v20  ;;  %469 = vmatpush1.msra.mxu0 %v450_v21  ;;  %v429_v42 = vld [vmem:[#allocation9 + $0x10] sm:$0xff]  ;;  %v428_v43 = vld [vmem:[#allocation9 + $0x8] sm:$0xff] }
  0x98   : > { %1892 = vmatpush1.msra.mxu1 %v450_v21  ;;  %470 = vmatprep.subr.mxu0 %v449_v22 }
  0x99   : > { %1877 = vmatprep.subr.mxu1 %v449_v22  ;;  %471 = vmatpush1.msra.mxu0 %v448_v23 }
  0x9a   : > { %1893 = vmatpush1.msra.mxu1 %v448_v23  ;;  %472 = vmatprep.subr.mxu0 %v447_v24 }
  0x9b   : > { %1878 = vmatprep.subr.mxu1 %v447_v24  ;;  %473 = vmatpush1.msra.mxu0 %v446_v25 }
  0x9c   : > { %1894 = vmatpush1.msra.mxu1 %v446_v25  ;;  %474 = vmatprep.subr.mxu0 %v445_v26 }
  0x9d   : > { %1879 = vmatprep.subr.mxu1 %v445_v26  ;;  %475 = vmatpush1.msra.mxu0 %v444_v27 }
  0x9e   : > { %1895 = vmatpush1.msra.mxu1 %v444_v27  ;;  %476 = vmatprep.subr.mxu0 %v443_v28 }
  0x9f   : > { %1880 = vmatprep.subr.mxu1 %v443_v28  ;;  %477 = vmatpush1.msra.mxu0 %v442_v29 }
  0xa0   : > { %1896 = vmatpush1.msra.mxu1 %v442_v29  ;;  %478 = vmatprep.subr.mxu0 %v441_v30 }
  0xa1   : > { %1881 = vmatprep.subr.mxu1 %v441_v30  ;;  %479 = vmatpush1.msra.mxu0 %v440_v31 }
  0xa2   : > { %1897 = vmatpush1.msra.mxu1 %v440_v31  ;;  %480 = vmatprep.subr.mxu0 %v439_v32 }
  0xa3   : > { %1882 = vmatprep.subr.mxu1 %v439_v32  ;;  %481 = vmatpush1.msra.mxu0 %v438_v33 }
  0xa4   : > { %1898 = vmatpush1.msra.mxu1 %v438_v33  ;;  %482 = vmatprep.subr.mxu0 %v437_v34 }
  0xa5   : > { %1883 = vmatprep.subr.mxu1 %v437_v34  ;;  %483 = vmatpush1.msra.mxu0 %v436_v35 }
  0xa6   : > { %1899 = vmatpush1.msra.mxu1 %v436_v35  ;;  %484 = vmatprep.subr.mxu0 %v435_v36 }
  0xa7   : > { %1884 = vmatprep.subr.mxu1 %v435_v36  ;;  %485 = vmatpush1.msra.mxu0 %v434_v37 }
  0xa8   : > { %1900 = vmatpush1.msra.mxu1 %v434_v37  ;;  %486 = vmatprep.subr.mxu0 %v433_v38 }
  0xa9   : > { %1885 = vmatprep.subr.mxu1 %v433_v38  ;;  %487 = vmatpush1.msra.mxu0 %v432_v39 }
  0xaa   : > { %1901 = vmatpush1.msra.mxu1 %v432_v39  ;;  %488 = vmatprep.subr.mxu0 %v431_v40 }
  0xab   : > { %489 = vmatpush1.msra.mxu0 %v430_v41  ;;  %1886 = vmatprep.subr.mxu1 %v431_v40 }
  0xac   : > { %490 = vmatprep.subr.mxu0 %v429_v42  ;;  %1902 = vmatpush1.msra.mxu1 %v430_v41 }
  0xad   : > { %491 = vmatpush1.msra.mxu0 %v428_v43  ;;  %1887 = vmatprep.subr.mxu1 %v429_v42 }
  0xae   : > { %1903 = vmatpush1.msra.mxu1 %v428_v43  ;;  %530 = vmatprep.mubr.f32.mxu1 %v2317_v44 }
 0x116   : > { %v390_v12 = vpop.xlane.xlu0 %389 }
 0x117   : > { %v394_v13 = vmul.f32 0.0078125, %v390_v12 }
 0x119   : > { %v2596_v14 = vsub.f32 %v387_v2, %v394_v13 }
 0x11a   : > { %v392_v15 = vpop.xlane.xlu0 %391 }
 0x11b   : > { %v395_v16 = vmul.f32 0.0078125, %v392_v15  ;;  %v398_v17 = vmul.f32 %v2596_v14, %v2596_v14 }
 0x11d   : > { %v2600_v18 = vsub.f32 %v388_v3, %v395_v16  ;;  %400 = vadd.xlane.f32.xlu1 %v398_v17 }
 0x11f   : > { %v399_v19 = vmul.f32 %v2600_v18, %v2600_v18 }
 0x121   : > { %402 = vadd.xlane.f32.xlu1 %v399_v19 }
 0x1a6   : > { %v401_v45 = vpop.xlane.xlu1 %400 }
 0x1a7   : > { %v404_v46 = vmul.f32 0.0078125, %v401_v45 }
 0x1a9   : > { %v406_v47 = vadd.f32 1e-05, %v404_v46 }
 0x1aa   : > { %v403_v48 = vpop.xlane.xlu1 %402 }
 0x1ab   : > { %2045 = vrsqrt.f32 %v406_v47  ;;  %v405_v49 = vmul.f32 0.0078125, %v403_v48 }
 0x1ad   : > { %v407_v51 = vadd.f32 1e-05, %v405_v49 }
 0x1af   : > { %2047 = vrsqrt.f32 %v407_v51 }
 0x1b8   : > { %v2046_v55 = vpop.eup %2045 }
 0x1b9   : > { %v410_v56 = vmul.f32 %v2046_v55, %v2596_v14 }
 0x1bb   : > { %v418_v58 = vmul.f32 %v416_v54, %v410_v56 }
 0x1bc   : > { %v2048_v59 = vpop.eup %2047 }
 0x1bd   : > { %v426_v60 = vadd.f32 %v424_v57, %v418_v58  ;;  %v411_v61 = vmul.f32 %v2048_v59, %v2600_v18 }
 0x1bf   : > { %525 = vmatmul.mubr.f32.vlgmr.msra.gmra.mxu0 %v426_v60  ;;  %v419_v62 = vmul.f32 %v416_v54, %v411_v61 }
 0x1c1   : > { %v427_v63 = vadd.f32 %v424_v57, %v419_v62 }
 0x1c3   : > { %531 = vmatmul.mubr.f32.vlgmr.msra.gmra.mxu1 %v427_v63 }
 0x27f   : > { %v526_v2 = vpop.f32.mrf.mxu0 }
 0x280   : > { %538 = vst.msk [vmem:[#allocation2] sm:$0xff] %vm537_vm0, %v526_v2  ;;  %544 = vrot.lane.b32.xlu0 %v526_v2, %s2318_s12 }
 0x281   : > { %v528_v3 = vpop.f32.mrf.mxu0 }
 0x282   : > { %540 = vst.msk [vmem:[#allocation3] sm:$0xff] %vm537_vm0, %v528_v3 }
 0x283   : > { %v532_v4 = vpop.f32.mrf.mxu1 }
 0x284   : > { %539 = vst.msk [vmem:[#allocation2 + $0x8] sm:$0xff] %vm537_vm0, %v532_v4  ;;  %564 = vrot.lane.b32.xlu0 %v526_v2, %s2319_s0  ;;  %546 = vrot.lane.b32.xlu1 %v532_v4, %s2318_s12 }
 0x285   : > { %v534_v5 = vpop.f32.mrf.mxu1 }
 0x286   : > { %541 = vst.msk [vmem:[#allocation3 + $0x8] sm:$0xff] %vm537_vm0, %v534_v5 }
 0x288   : > { %582 = vrot.lane.b32.xlu0 %v526_v2, %s2320_s3  ;;  %566 = vrot.lane.b32.xlu1 %v532_v4, %s2319_s0 }
 0x28c   : > { %573 = vrot.lane.b32.xlu0 %v528_v3, %s2319_s0  ;;  %584 = vrot.lane.b32.xlu1 %v532_v4, %s2320_s3 }
 0x290   : > { %591 = vrot.lane.b32.xlu0 %v528_v3, %s2320_s3  ;;  %555 = vrot.lane.b32.xlu1 %v528_v3, %s2318_s12 }
 0x294   : > { %557 = vrot.lane.b32.xlu1 %v534_v5, %s2318_s12 }
 0x298   : > { %575 = vrot.lane.b32.xlu1 %v534_v5, %s2319_s0 }
 0x29c   : > { %593 = vrot.lane.b32.xlu1 %v534_v5, %s2320_s3 }
 0x2f2   : > { %v545_v6 = vpop.permute.xlu0 %544 }
 0x2f3   : > { %551 = vst.msk [vmem:[#allocation2 + $0x10] sm:$0xff] %vm537_vm0, %v545_v6 }
 0x2f6   : > { %v547_v7 = vpop.permute.xlu1 %546  ;;  %v565_v8 = vpop.permute.xlu0 %564 }
 0x2f7   : > { %552 = vst.msk [vmem:[#allocation2 + $0x18] sm:$0xff] %vm537_vm0, %v547_v7  ;;  %571 = vst.msk [vmem:[#allocation2 + $0x20] sm:$0xff] %vm537_vm0, %v565_v8 }
 0x2fa   : > { %v567_v9 = vpop.permute.xlu1 %566  ;;  %v583_v10 = vpop.permute.xlu0 %582 }
 0x2fb   : > { %572 = vst.msk [vmem:[#allocation2 + $0x28] sm:$0xff] %vm537_vm0, %v567_v9  ;;  %589 = vst.msk [vmem:[#allocation2 + $0x30] sm:$0xff] %vm537_vm0, %v583_v10 }
 0x2fe   : > { %v585_v11 = vpop.permute.xlu1 %584  ;;  %v574_v12 = vpop.permute.xlu0 %573 }
 0x2ff   : > { %590 = vst.msk [vmem:[#allocation2 + $0x38] sm:$0xff] %vm537_vm0, %v585_v11  ;;  %580 = vst.msk [vmem:[#allocation3 + $0x20] sm:$0xff] %vm537_vm0, %v574_v12 }
 0x302   : > { %v556_v13 = vpop.permute.xlu1 %555  ;;  %v592_v14 = vpop.permute.xlu0 %591 }
 0x303   : > { %562 = vst.msk [vmem:[#allocation3 + $0x10] sm:$0xff] %vm537_vm0, %v556_v13  ;;  %598 = vst.msk [vmem:[#allocation3 + $0x30] sm:$0xff] %vm537_vm0, %v592_v14 }
 0x306   : > { %v558_v15 = vpop.permute.xlu1 %557 }
 0x307   : > { %563 = vst.msk [vmem:[#allocation3 + $0x18] sm:$0xff] %vm537_vm0, %v558_v15 }
 0x30a   : > { %v576_v16 = vpop.permute.xlu1 %575 }
 0x30b   : > { %581 = vst.msk [vmem:[#allocation3 + $0x28] sm:$0xff] %vm537_vm0, %v576_v16 }
 0x30e   : > { %v594_v17 = vpop.permute.xlu1 %593 }
 0x30f   : > { %599 = vst.msk [vmem:[#allocation3 + $0x38] sm:$0xff] %vm537_vm0, %v594_v17 }
 0x310 PF: > { %v2626_v18 = vld [vmem:[%s337_s17] sm:$0xff]  ;;  %v642_v19 = vld [vmem:[#allocation9 + $0x168] sm:$0xff]  ;;  %v2321_v20 = vmov 0.0   ;;  %v639_v23 = vld [vmem:[#allocation9 + $0x120] sm:$0xff]  ;;  %vm2322_vm1 = vmmov 0   ;;  %vm728_vm2 = vcmask 261120   ;;  %v614_v45 = vlaneseq }
 0x311   : > { %601 = vadd.xlane.f32.xlu0 %v2626_v18  ;;  %1746 = vmatprep.subr.mxu0 %v2321_v20  ;;  %v641_v21 = vld [vmem:[#allocation9 + $0x150] sm:$0xff]  ;;  %v640_v22 = vld [vmem:[#allocation9 + $0x138] sm:$0xff]  ;;  %v638_v28 = vld [vmem:[#allocation9 + $0x108] sm:$0xff]  ;;  %s2323_s5 = smov 32   ;;  %s2324_s24 = smov 96   ;;  %vm1045_vm3 = vcmask 130048  }
 0x312   : > { %1781 = vmatprep.subr.mxu1 %v2321_v20  ;;  %1747 = vmatpush3.msra.mxu0 %v642_v19  ;;  %v637_v29 = vld [vmem:[#allocation9 + $0xf0] sm:$0xff]  ;;  %v636_v30 = vld [vmem:[#allocation9 + $0xd8] sm:$0xff]  ;;  %v635_v31 = vld [vmem:[#allocation9 + $0xc0] sm:$0xff]  ;;  %v615_v46 = vshrl.u32 %v614_v45, 7  ;;  %s2325_s7 = smov 64   ;;  %s2857_s8 = sld [smem:[#allocation20_spill]] }
 0x313   : > { %1748 = vmatprep.subr.mxu0 %v2321_v20  ;;  %1778 = vmatprep.mubr.msk.f32.mxu0 %vm2322_vm1, %v2321_v20  ;;  %v634_v32 = vld [vmem:[#allocation9 + $0xa8] sm:$0xff]  ;;  %v633_v33 = vld [vmem:[#allocation9 + $0x90] sm:$0xff]  ;;  %v632_v34 = vld [vmem:[#allocation9 + $0x78] sm:$0xff]  ;;  %s2858_s18 = sld [smem:[#allocation19_spill]]  ;;  %vm1403_vm4 = vcmask 523264   ;;  %vm1405_vm5 = vcmask 785408  }
 0x314   : > { %1749 = vmatpush3.msra.mxu0 %v641_v21  ;;  %1785 = vmatprep.mubr.msk.f32.mxu1 %vm2322_vm1, %v2321_v20  ;;  %v631_v35 = vld [vmem:[#allocation9 + $0x60] sm:$0xff]  ;;  %v630_v36 = vld [vmem:[#allocation9 + $0x48] sm:$0xff]  ;;  %v629_v37 = vld [vmem:[#allocation9 + $0x30] sm:$0xff]  ;;  %v616_v47 = vsub.s32 0, %v615_v46  ;;  %s2859_s27 = sld [smem:[#allocation22_spill]]  ;;  %s1519_s6 = sshll.u32 %s380_s22, 4  ;;  %s1520_s6 = int_to_ptr.vmem [resolvable:$true] %s1519_s6 }
 0x315   : > { %1750 = vmatprep.subr.mxu0 %v2321_v20  ;;  %v628_v38 = vld [vmem:[#allocation9 + $0x18] sm:$0xff]  ;;  %v627_v39 = vld [vmem:[#allocation9] sm:$0xff]  ;;  %v720_v41 = vld [vmem:[#allocation2] sm:$0xff]  ;;  %s2860_s19 = sld [smem:[#allocation30_spill]]  ;;  %s1504_s3 = scalar_lea.sflag [#allocation6], %s335_s2 }
 0x316   : > { %1751 = vmatpush3.msra.mxu0 %v640_v22  ;;  %v721_v40 = vld [vmem:[#allocation2 + $0x8] sm:$0xff]  ;;  %v617_v48 = vrot.slane %v2587_v0, %v616_v47  ;;  %v624_v51 = vrot.slane %v2592_v1, %v616_v47  ;;  %v723_v55 = vld [vmem:[#allocation2 + $0x18] sm:$0xff]  ;;  %v722_v1 = vld [vmem:[#allocation2 + $0x10] sm:$0xff]  ;;  %s2861_s12 = sld [smem:[#allocation31_spill]] }
 0x317   : > { %1752 = vmatprep.subr.mxu0 %v2321_v20  ;;  %1782 = vmatpush3.xpose.msk.msra.mxu1 %vm728_vm2, %v721_v40  ;;  %v725_v56 = vld [vmem:[#allocation2 + $0x28] sm:$0xff]  ;;  %v724_v58 = vld [vmem:[#allocation2 + $0x20] sm:$0xff]  ;;  %v727_v59 = vld [vmem:[#allocation2 + $0x38] sm:$0xff] }
 0x318   : > { %1753 = vmatpush3.msra.mxu0 %v639_v23  ;;  %1783 = vmatprep.subr.mxu1 %v2321_v20  ;;  %v726_v61 = vld [vmem:[#allocation2 + $0x30] sm:$0xff]  ;;  %s1683_s30 = sshll.u32 %s2857_s8, 1 }
 0x319   : > { %1754 = vmatprep.subr.mxu0 %v2321_v20  ;;  %v1092_v45 = vld [vmem:[#allocation3 + $0x10] sm:$0xff]  ;;  %s1515_s20 = sadd.s32 %s2858_s18, %s1683_s30 }
 0x31a   : > { %1755 = vmatpush3.msra.mxu0 %v638_v28  ;;  %s1684_s16 = sshll.u32 %s1515_s20, 7  ;;  %p2862_p2 = scmp.ne.s32.totalorder %s2859_s27, 0 }
 0x31b   : > { %1756 = vmatprep.subr.mxu0 %v2321_v20  ;;  %1784 = vmatpush3.xpose.msk.msra.mxu1 %vm728_vm2, %v720_v41 }
 0x31c   : > { %1757 = vmatpush3.msra.mxu0 %v637_v29  ;;  %1788 = vmatprep.subr.mxu1 %v2321_v20  ;;  %s2745_s0 = scalar_lea.hbm %s2861_s12, %s1684_s16 }
 0x31d   : > { %1758 = vmatprep.subr.mxu0 %v2321_v20 }
 0x31e   : > { %1759 = vmatpush3.msra.mxu0 %v636_v30 }
 0x31f   : > { %1760 = vmatprep.subr.mxu0 %v2321_v20 }
 0x320   : > { %1761 = vmatpush3.msra.mxu0 %v635_v31 }
 0x321   : > { %1762 = vmatprep.subr.mxu0 %v2321_v20 }
 0x322   : > { %1763 = vmatpush3.msra.mxu0 %v634_v32 }
 0x323   : > { %1764 = vmatprep.subr.mxu0 %v2321_v20 }
 0x324   : > { %1765 = vmatpush3.msra.mxu0 %v633_v33 }
 0x325   : > { %1766 = vmatprep.subr.mxu0 %v2321_v20 }
 0x326   : > { %1767 = vmatpush3.msra.mxu0 %v632_v34 }
 0x327   : > { %1768 = vmatprep.subr.mxu0 %v2321_v20 }
 0x328   : > { %1769 = vmatpush3.msra.mxu0 %v631_v35 }
 0x329   : > { %1770 = vmatprep.subr.mxu0 %v2321_v20 }
 0x32a   : > { %1771 = vmatpush3.msra.mxu0 %v630_v36 }
 0x32b   : > { %1772 = vmatprep.subr.mxu0 %v2321_v20 }
 0x32c   : > { %1773 = vmatpush3.msra.mxu0 %v629_v37 }
 0x32d   : > { %1774 = vmatprep.subr.mxu0 %v2321_v20 }
 0x32e   : > { %1775 = vmatpush3.msra.mxu0 %v628_v38 }
 0x32f   : > { %1776 = vmatprep.subr.mxu0 %v2321_v20 }
 0x330   : > { %1777 = vmatpush3.msra.mxu0 %v627_v39 }
 0x331   : > { %1837 = vmatprep.subr.mxu0 %v2321_v20 }
 0x39a   : > { %v602_v24 = vpop.xlane.xlu0 %601 }
 0x39b   : > { %v604_v25 = vmul.f32 0.0078125, %v602_v24  ;;  %v1091_v24 = vld [vmem:[#allocation3 + $0x8] sm:$0xff] }
 0x39d   : > { %v605_v26 = vsub.f32 %v2626_v18, %v604_v25  ;;  %v1090_v25 = vld [vmem:[#allocation3] sm:$0xff] }
 0x39f   : > { %v606_v27 = vmul.f32 %v605_v26, %v605_v26 }
 0x3a1   : > { %607 = vadd.xlane.f32.xlu0 %v606_v27 }
 0x42a   : > { %v608_v42 = vpop.xlane.xlu0 %607 }
 0x42b   : > { %v609_v43 = vmul.f32 0.0078125, %v608_v42 }
 0x42d   : > { %v610_v44 = vadd.f32 1e-05, %v609_v43 }
 0x42f   : > { %2049 = vrsqrt.f32 %v610_v44  ;;  %v1093_v44 = vld [vmem:[#allocation3 + $0x18] sm:$0xff] }
 0x43c   : > { %v2050_v49 = vpop.eup %2049 }
 0x43d   : > { %v612_v50 = vmul.f32 %v2050_v49, %v605_v26 }
 0x43f   : > { %v619_v52 = vmul.f32 %v617_v48, %v612_v50  ;;  %v1095_v50 = vld [vmem:[#allocation3 + $0x28] sm:$0xff] }
 0x441   : > { %v626_v53 = vadd.f32 %v624_v51, %v619_v52  ;;  %v1094_v52 = vld [vmem:[#allocation3 + $0x20] sm:$0xff] }
 0x443   : > { %1779 = vmatmul.mubr.f32.vlgmr.msra.gmra.mxu0 %v626_v53 }
 0x444   : > { %1869 = vmatprep.mubr.msk.f32.mxu0 %vm2322_vm1, %v2321_v20 }
 0x503   : > { %v709_v54 = vpop.f32.mrf.mxu0 }
 0x504   : > { %718 = vrot.lane.b32.xlu0 %v709_v54, %s2323_s5  ;;  %714 = vrot.lane.b32.xlu1 %v709_v54, %s2324_s24 }
 0x505   : > { %1786 = vmatmul.mubr.msk.f32.vlgmr.msra.gmra.mxu1 %vm728_vm2, %v709_v54  ;;  %v1780_v0 = vpop.f32.mrf.mxu0 }
 0x506   : > { %1789 = vmatpush3.xpose.msk.msra.mxu1 %vm728_vm2, %v723_v55  ;;  %1792 = vmatprep.mubr.msk.f32.mxu1 %vm2322_vm1, %v2321_v20  ;;  %v1097_v55 = vld [vmem:[#allocation3 + $0x38] sm:$0xff]  ;;  %v1096_v0 = vld [vmem:[#allocation3 + $0x30] sm:$0xff] }
 0x507   : > { %1790 = vmatprep.subr.mxu1 %v2321_v20 }
 0x508   : > { %716 = vrot.lane.b32.xlu1 %v709_v54, %s2325_s7 }
 0x50a   : > { %1791 = vmatpush3.xpose.msk.msra.mxu1 %vm728_vm2, %v722_v1 }
 0x50b   : > { %1795 = vmatprep.subr.mxu1 %v2321_v20 }
 0x576   : > { %v715_v57 = vpop.permute.xlu1 %714  ;;  %v719_v62 = vpop.permute.xlu0 %718 }
 0x577   : > { %1793 = vmatmul.mubr.msk.f32.vlgmr.msra.gmra.mxu1 %vm728_vm2, %v715_v57 }
 0x578   : > { %1796 = vmatpush3.xpose.msk.msra.mxu1 %vm728_vm2, %v725_v56  ;;  %1799 = vmatprep.mubr.msk.f32.mxu1 %vm2322_vm1, %v2321_v20 }
 0x579   : > { %1797 = vmatprep.subr.mxu1 %v2321_v20 }
 0x57a   : > { %v717_v60 = vpop.permute.xlu1 %716 }
 0x57c   : > { %1798 = vmatpush3.xpose.msk.msra.mxu1 %vm728_vm2, %v724_v58 }
 0x57d   : > { %1802 = vmatprep.subr.mxu1 %v2321_v20 }
 0x57f   : > { %1800 = vmatmul.mubr.msk.f32.vlgmr.msra.gmra.mxu1 %vm728_vm2, %v717_v60  ;;  %v1429_v60 = vld [vmem:[#allocation10 + $0x70] sm:$0xff] }
 0x580   : > { %1803 = vmatpush3.xpose.msk.msra.mxu1 %vm728_vm2, %v727_v59  ;;  %1806 = vmatprep.mubr.msk.f32.mxu1 %vm2322_vm1, %v2321_v20  ;;  %v1430_v59 = vld [vmem:[#allocation10 + $0x78] sm:$0xff] }
 0x581   : > { %1804 = vmatprep.subr.mxu1 %v2321_v20  ;;  %1838 = vmatpush3.msra.mxu0 %v1430_v59 }
 0x582   : > { %1839 = vmatprep.subr.mxu0 %v2321_v20 }
 0x583   : > { %1840 = vmatpush3.msra.mxu0 %v1429_v60 }
 0x584   : > { %1805 = vmatpush3.xpose.msk.msra.mxu1 %vm728_vm2, %v726_v61  ;;  %v1428_v61 = vld [vmem:[#allocation10 + $0x68] sm:$0xff]  ;;  %1841 = vmatprep.subr.mxu0 %v2321_v20 }
 0x585   : > { %1809 = vmatprep.subr.mxu1 %v2321_v20  ;;  %1842 = vmatpush3.msra.mxu0 %v1428_v61 }
 0x586   : > { %1843 = vmatprep.subr.mxu0 %v2321_v20 }
 0x587   : > { %1807 = vmatmul.mubr.msk.f32.vlgmr.msra.gmra.mxu1 %vm728_vm2, %v719_v62  ;;  %v1427_v62 = vld [vmem:[#allocation10 + $0x60] sm:$0xff] }
 0x588   : > { %1813 = vmatprep.mubr.msk.f32.mxu1 %vm2322_vm1, %v2321_v20  ;;  %1810 = vmatpush3.msra.mxu1 %v1091_v24 }
 0x589   : > { %1811 = vmatprep.subr.mxu1 %v2321_v20  ;;  %1844 = vmatpush3.msra.mxu0 %v1427_v62 }
 0x58a   : > { %1812 = vmatpush3.msra.mxu1 %v1090_v25  ;;  %1845 = vmatprep.subr.mxu0 %v2321_v20 }
 0x58b   : > { %1816 = vmatprep.subr.mxu1 %v2321_v20 }
 0x5c5   : > { %v803_v63 = vpop.f32.mrf.mxu1 }
 0x5c6   : > { %v1041_v2 = vmul.f32 0.17677669, %v803_v63  ;;  %v1426_v63 = vld [vmem:[#allocation10 + $0x58] sm:$0xff] }
 0x5c7   : > { %v1787_v3 = vpop.f32.mrf.mxu1  ;;  %1846 = vmatpush3.msra.mxu0 %v1426_v63 }
 0x5c8   : > { %v1046_v4 = vsel %vm1045_vm3, %v1041_v2, -inf  ;;  %1847 = vmatprep.subr.mxu0 %v2321_v20  ;;  %v1424_v3 = vld [vmem:[#allocation10 + $0x48] sm:$0xff] }
 0x5c9   : > { %1047 = vmax.xlane.f32.xlu1 %v1046_v4  ;;  %v1423_v4 = vld [vmem:[#allocation10 + $0x40] sm:$0xff] }
 0x637   : > { %v881_v5 = vpop.f32.mrf.mxu1 }
 0x638   : > { %v1042_v6 = vmul.f32 0.17677669, %v881_v5  ;;  %v1422_v5 = vld [vmem:[#allocation10 + $0x38] sm:$0xff] }
 0x639   : > { %v1794_v7 = vpop.f32.mrf.mxu1 }
 0x63a   : > { %v1049_v8 = vsel %vm1045_vm3, %v1042_v6, -inf  ;;  %v1420_v7 = vld [vmem:[#allocation10 + $0x28] sm:$0xff] }
 0x63b   : > { %1050 = vmax.xlane.f32.xlu0 %v1049_v8  ;;  %v1419_v8 = vld [vmem:[#allocation10 + $0x20] sm:$0xff] }
 0x63f   : > { %v959_v9 = vpop.f32.mrf.mxu1 }
 0x640   : > { %v1043_v10 = vmul.f32 0.17677669, %v959_v9  ;;  %v1418_v9 = vld [vmem:[#allocation10 + $0x18] sm:$0xff] }
 0x641   : > { %v1801_v11 = vpop.f32.mrf.mxu1 }
 0x642   : > { %v1052_v12 = vsel %vm1045_vm3, %v1043_v10, -inf  ;;  %v1416_v11 = vld [vmem:[#allocation10 + $0x8] sm:$0xff] }
 0x643   : > { %1053 = vmax.xlane.f32.xlu1 %v1052_v12 }
 0x647   : > { %v1037_v13 = vpop.f32.mrf.mxu1 }
 0x648   : > { %v1044_v14 = vmul.f32 0.17677669, %v1037_v13 }
 0x649   : > { %v1808_v15 = vpop.f32.mrf.mxu1 }
 0x64a   : > { %v1055_v16 = vsel %vm1045_vm3, %v1044_v14, -inf }
 0x64b   : > { %1056 = vmax.xlane.f32.xlu1 %v1055_v16 }
 0x652   : > { %v1048_v17 = vpop.xlane.xlu1 %1047 }
 0x653   : > { %v1058_v19 = vsub.f32 %v1041_v2, %v1048_v17  ;;  %v1425_v2 = vld [vmem:[#allocation10 + $0x50] sm:$0xff] }
 0x654   : > { %1848 = vmatpush3.msra.mxu0 %v1425_v2 }
 0x655   : > { %v1062_v21 = vmul.f32 1.442695, %v1058_v19  ;;  %1849 = vmatprep.subr.mxu0 %v2321_v20 }
 0x656   : > { %1850 = vmatpush3.msra.mxu0 %v1424_v3 }
 0x657   : > { %2051 = vpow2.f32 %v1062_v21  ;;  %1851 = vmatprep.subr.mxu0 %v2321_v20 }
 0x658   : > { %1852 = vmatpush3.msra.mxu0 %v1423_v4 }
 0x659   : > { %1853 = vmatprep.subr.mxu0 %v2321_v20 }
 0x65a   : > { %1854 = vmatpush3.msra.mxu0 %v1422_v5 }
 0x65b   : > { %1855 = vmatprep.subr.mxu0 %v2321_v20 }
 0x664   : > { %v2052_v22 = vpop.eup %2051 }
 0x665   : > { %v1070_v23 = vsel %vm1045_vm3, %v2052_v22, 0.0 }
 0x666   : > { %1071 = vadd.xlane.f32.xlu1 %v1070_v23 }
 0x6c4   : > { %v1051_v26 = vpop.xlane.xlu0 %1050 }
 0x6c5   : > { %v1059_v27 = vsub.f32 %v1042_v6, %v1051_v26  ;;  %v1421_v6 = vld [vmem:[#allocation10 + $0x30] sm:$0xff] }
 0x6c6   : > { %1856 = vmatpush3.msra.mxu0 %v1421_v6  ;;  %v1681_v26 = vld [vmem:[%s2860_s19] ss:$0 sm:$0xff] }
 0x6c7   : > { %v1064_v28 = vmul.f32 1.442695, %v1059_v27  ;;  %1857 = vmatprep.subr.mxu0 %v2321_v20  ;;  %v1414_v27 = vadd.f32 %v1681_v26, %v2626_v18 }
 0x6c8   : > { %1858 = vmatpush3.msra.mxu0 %v1420_v7 }
 0x6c9   : > { %2053 = vpow2.f32 %v1064_v28  ;;  %1859 = vmatprep.subr.mxu0 %v2321_v20 }
 0x6ca   : > { %1860 = vmatpush3.msra.mxu0 %v1419_v8 }
 0x6cb   : > { %1861 = vmatprep.subr.mxu0 %v2321_v20 }
 0x6cc   : > { %v1054_v29 = vpop.xlane.xlu1 %1053  ;;  %1862 = vmatpush3.msra.mxu0 %v1418_v9 }
 0x6cd   : > { %v1060_v30 = vsub.f32 %v1043_v10, %v1054_v29  ;;  %v1417_v10 = vld [vmem:[#allocation10 + $0x10] sm:$0xff]  ;;  %1863 = vmatprep.subr.mxu0 %v2321_v20 }
 0x6ce   : > { %1864 = vmatpush3.msra.mxu0 %v1417_v10 }
 0x6cf   : > { %v1066_v31 = vmul.f32 1.442695, %v1060_v30  ;;  %1865 = vmatprep.subr.mxu0 %v2321_v20 }
 0x6d0   : > { %1866 = vmatpush3.msra.mxu0 %v1416_v11 }
 0x6d1   : > { %2055 = vpow2.f32 %v1066_v31  ;;  %1867 = vmatprep.subr.mxu0 %v2321_v20 }
 0x6d4   : > { %v1057_v32 = vpop.xlane.xlu1 %1056 }
 0x6d5   : > { %v1061_v33 = vsub.f32 %v1044_v14, %v1057_v32  ;;  %v1415_v14 = vld [vmem:[#allocation10] sm:$0xff] }
 0x6d6   : > { %v2054_v34 = vpop.eup %2053  ;;  %1868 = vmatpush3.msra.mxu0 %v1415_v14 }
 0x6d7   : > { %v1068_v35 = vmul.f32 1.442695, %v1061_v33  ;;  %v1073_v36 = vsel %vm1045_vm3, %v2054_v34, 0.0 }
 0x6d8   : > { %1074 = vadd.xlane.f32.xlu1 %v1073_v36 }
 0x6d9   : > { %2057 = vpow2.f32 %v1068_v35 }
 0x6de   : > { %v2056_v37 = vpop.eup %2055 }
 0x6df   : > { %v1076_v38 = vsel %vm1045_vm3, %v2056_v37, 0.0 }
 0x6e0   : > { %1077 = vadd.xlane.f32.xlu1 %v1076_v38 }
 0x6e6   : > { %v2058_v39 = vpop.eup %2057 }
 0x6e7   : > { %v1079_v40 = vsel %vm1045_vm3, %v2058_v39, 0.0 }
 0x6e8   : > { %1080 = vadd.xlane.f32.xlu0 %v1079_v40 }
 0x6ef   : > { %v1072_v41 = vpop.xlane.xlu1 %1071 }
 0x6f0   : > { %2059 = vrcp.f32 %v1072_v41 }
 0x6fd   : > { %v2060_v42 = vpop.eup %2059 }
 0x6fe   : > { %v1086_v43 = vmul.f32 %v2060_v42, %v2052_v22 }
 0x700   : > { %1814 = vmatmul.mubr.msk.f32.vlgmr.msra.gmra.mxu1 %vm1045_vm3, %v1086_v43 }
 0x701   : > { %1817 = vmatpush3.msra.mxu1 %v1093_v44  ;;  %1820 = vmatprep.mubr.msk.f32.mxu1 %vm2322_vm1, %v2321_v20 }
 0x702   : > { %1818 = vmatprep.subr.mxu1 %v2321_v20 }
 0x703   : > { %1819 = vmatpush3.msra.mxu1 %v1092_v45 }
 0x704   : > { %1823 = vmatprep.subr.mxu1 %v2321_v20 }
 0x761   : > { %v1075_v46 = vpop.xlane.xlu1 %1074 }
 0x762   : > { %2061 = vrcp.f32 %v1075_v46 }
 0x769   : > { %v1078_v47 = vpop.xlane.xlu1 %1077 }
 0x76a   : > { %2063 = vrcp.f32 %v1078_v47 }
 0x76f   : > { %v2062_v48 = vpop.eup %2061 }
 0x770   : > { %v1087_v49 = vmul.f32 %v2062_v48, %v2054_v34 }
 0x771   : > { %v1081_v51 = vpop.xlane.xlu0 %1080 }
 0x772   : > { %2065 = vrcp.f32 %v1081_v51  ;;  %1821 = vmatmul.mubr.msk.f32.vlgmr.msra.gmra.mxu1 %vm1045_vm3, %v1087_v49 }
 0x773   : > { %1824 = vmatpush3.msra.mxu1 %v1095_v50  ;;  %1827 = vmatprep.mubr.msk.f32.mxu1 %vm2322_vm1, %v2321_v20 }
 0x774   : > { %1825 = vmatprep.subr.mxu1 %v2321_v20 }
 0x775   : > { %1826 = vmatpush3.msra.mxu1 %v1094_v52 }
 0x776   : > { %1830 = vmatprep.subr.mxu1 %v2321_v20 }
 0x777   : > { %v2064_v53 = vpop.eup %2063 }
 0x778   : > { %v1088_v54 = vmul.f32 %v2064_v53, %v2056_v37 }
 0x77a   : > { %1828 = vmatmul.mubr.msk.f32.vlgmr.msra.gmra.mxu1 %vm1045_vm3, %v1088_v54 }
 0x77b   : > { %1831 = vmatpush3.msra.mxu1 %v1097_v55  ;;  %1834 = vmatprep.mubr.msk.f32.mxu1 %vm2322_vm1, %v2321_v20 }
 0x77c   : > { %1832 = vmatprep.subr.mxu1 %v2321_v20 }
 0x77d   : > { %1833 = vmatpush3.msra.mxu1 %v1096_v0 }
 0x77f   : > { %v2066_v1 = vpop.eup %2065 }
 0x780   : > { %v1089_v56 = vmul.f32 %v2066_v1, %v2058_v39 }
 0x782   : > { %1835 = vmatmul.mubr.msk.f32.vlgmr.msra.gmra.mxu1 %vm1045_vm3, %v1089_v56 }
 0x7c0   : > { %v2712_v57 = vpop.f32.mrf.mxu1 }
 0x7c2   : > { %v1815_v58 = vpop.f32.mrf.mxu1 }
 0x832   : > { %v1240_v12 = vpop.f32.mrf.mxu1 }
 0x833   : > { %1391 = vrot.lane.b32.xlu1 %v1240_v12, %s2323_s5  ;;  %s2175_s5 = scalar_lea.vmem %s1520_s6, 128 }
 0x834   : > { %v1822_v13 = vpop.f32.mrf.mxu1  ;;  %p2176_p1 = scmp.ne.s32.totalorder %s1520_s6, %s2175_s5 }
 0x836   : > { %p2177_p4 = pnand %p2176_p1, %p2862_p2 }
 0x838   : > { %p2178_p7 = pneg %p2177_p4 }
 0x83a   : > { %v1313_v15 = vpop.f32.mrf.mxu1 }
 0x83b   : > { %1395 = vrot.lane.b32.xlu0 %v1313_v15, %s2325_s7 }
 0x83c   : > { %v1829_v16 = vpop.f32.mrf.mxu1 }
 0x842   : > { %v1386_v17 = vpop.f32.mrf.mxu1 }
 0x843   : > { %1399 = vrot.lane.b32.xlu1 %v1386_v17, %s2324_s24  ;;  %s2326_s24 = smov [#allocation12]  }
 0x844   : > { %v1836_v19 = vpop.f32.mrf.mxu1  ;;  %s2179_s7 = sshll.u32 %s2326_s24, 4  ;;  %s2180_s7 = int_to_ptr.vmem [resolvable:$false] %s2179_s7 }
 0x845   : > { %s2181_s8 = scalar_lea.vmem %s2180_s7, 256  ;;  %p2182_p10 = scmp.lt.s32.totalorder %s1520_s6, %s2180_s7 }
 0x846   : > { %p2183_p13 = scmp.lt.s32.totalorder %s2181_s8, %s2175_s5 }
 0x848   : > { %p2184_p12 = por %p2183_p13, %p2182_p10 }
 0x84a   : > { %p2185_p0 = pnand %p2184_p12, %p2178_p7 }
 0x8a5   : > { %v1392_v21 = vpop.permute.xlu1 %1391 }
 0x8a6   : > { %v1402_v20 = vsel %vm728_vm2, %v2712_v57, %v1392_v21 }
 0x8ad   : > { %v1396_v22 = vpop.permute.xlu0 %1395 }
 0x8ae   : > { %v1404_v23 = vsel %vm1403_vm4, %v1402_v20, %v1396_v22 }
 0x8b5   : > { %v1400_v24 = vpop.permute.xlu1 %1399 }
 0x8b6   : > { %v1406_v25 = vsel %vm1405_vm5, %v1404_v23, %v1400_v24 }
 0x8b7   : > { %1870 = vmatmul.mubr.f32.vlgmr.msra.gmra.mxu0 %v1406_v25 }
 0x977   : > { %v1497_v28 = vpop.f32.mrf.mxu0 }
 0x978   : > { %v1501_v29 = vadd.f32 %v1497_v28, %v1414_v27 }
 0x979   : > { %v1871_v30 = vpop.f32.mrf.mxu0 }
 0x97a   : > { %1502 = vst [vmem:[%s380_s22] sm:$0xff] %v1501_v29 }
 0x97b   : > { %2188 = shalt.err (!%p2185_p0)
}
 0x97c   : > { %s2189_s14 = scalar_lea.hbm %s2745_s0, 128  ;;  %s2193_s18 = scalar_lea.hbm %s2861_s12, 512 }
 0x97d   : > { %p2190_p8 = scmp.ne.s32.totalorder %s2745_s0, %s2189_s14  ;;  %p2194_p9 = scmp.lt.s32.totalorder %s2745_s0, %s2861_s12 }
 0x97e   : > { %p2195_p3 = scmp.lt.s32.totalorder %s2193_s18, %s2189_s14 }
 0x97f   : > { %p2191_p6 = pnand %p2190_p8, %p2862_p2 }
 0x980   : > { %p2196_p11 = por %p2195_p3, %p2194_p9 }
 0x981   : > { %p2192_p5 = pneg %p2191_p6 }
 0x983   : > { %p2197_p1 = pnand %p2196_p11, %p2192_p5 }
 0x985   : > { %2200 = shalt.err (!%p2197_p1)
}
 0x986   : > { %1916 = dma.vmem_to_hbm [thread:$0]  (%p2862_p2), %s1520_s6, 128, %s2745_s0, %s1504_s3  }
 0x987 PF: > { %s2863_s13 = sld [smem:[#allocation18_spill]]  ;;  %p1941_p4 = scmp.ge.s32.totalorder %s2307_s11, 2 }
 0x988   : > { %s2864_s19 = sld [smem:[#allocation24_spill]] }
 0x98d   : > { %s1531_s20 = sand.u32 1, %s2863_s13  }
 0x98e   : > { %p2865_p7 = scmp.ne.s32.totalorder %s2864_s19, 0  ;;  %s1532_s16 = scalar_lea.sflag [#allocation6], %s1531_s20 }
 0x990   : > { %p1933_p10 = pnand %p1941_p4, %p2865_p7 }
 0x992   : > { %p1934_p13 = pneg %p1933_p10 }
 0x994   : > { %2262 = dma.done.wait (%p1934_p13), %s1532_s16, 128  }
 0x995   : > { %2264 = vsyncadd (%p1934_p13), %s1532_s16, 4294967168  ;;  %s27_s11 = sadd.s32 1, %s2307_s11   ;;  %s2866_s6 = sld [smem:[#allocation21_spill]] }
 0x996   : > { %p24_p12 = scmp.ge.s32.totalorder %s27_s11, 6   ;;  %s2867_s23 = sld [smem:[#allocation23_spill]] }
 0x997   : > { %s2868_s24 = smov %s2271_s25  ;;  %s2869_s25 = smov %s2275_s26 }
 0x998   : > { %s2870_s26 = smov %s2538_s4  ;;  %s2871_s27 = smov %s2283_s28 }
 0x999   : > { %s2872_s28 = smov %s2287_s29  ;;  %s2873_s29 = smov %s2535_s21 }
 0x99a   : > { %s2874_s30 = smov %s2299_s9  ;;  %s2875_s8 = smov %s2303_s10 }
 0x99b   : > { %s2876_s9 = smov %s2866_s6  ;;  %26 = sbr.rel (!%p24_p12) target bundleno = 20 (0x14), region = 124 }
 0x99c   : > { %s2877_s10 = smov %s2867_s23 }
 0x9a0   :  { %1537 = vsyncpa [#allocation5], 1 }
 0x9a1   :  { %1539 = vsyncpa [#allocation5 + $0x1], 1 }
 0x9a2   :  { %1540 = vsyncpa [#allocation8], 1 }
 0x9a3   :  { %1542 = vsyncpa [#allocation8 + $0x1], 1 }
 0x9a4   :  { %1543 = vsyncpa [#allocation11], 1 }
 0x9a5   :  { %1544 = vsyncpa [#allocation6], 1 }
 0x9a6   :  { %1546 = vsyncpa [#allocation6 + $0x1], 1 }

</bundles_post_ra>
